<compile_context>
chip_gen: v6e
topology: v6e:2x2x1
jax: 0.10.0
libtpu: 0.0.40
codegen_flags: <defaults>
</compile_context>

<pallas_src>
import math

import jax
import jax.numpy as jnp
from jax.experimental import pallas as pl
from jax.experimental.pallas import tpu as pltpu


def _make_mca_kernel(B, C, H, W):
    BC, HW = B * C, H * W

    def kernel(x_ref, mixw_ref, wc_ref, wh_ref, ww_ref, o_ref):
        x = x_ref[...]                    # (BC, HW) float32, lane-dense
        xx = x * x

        # ---- hierarchical pooled sums ---------------------------------
        # per-(row, h) sums over w  -> (BC, H); reused for channel & h gates
        ph_cols, pph_cols = [], []
        for h in range(H):
            sl = x[:, h * W:(h + 1) * W]
            sl2 = xx[:, h * W:(h + 1) * W]
            ph_cols.append(jnp.sum(sl, axis=1, keepdims=True))
            pph_cols.append(jnp.sum(sl2, axis=1, keepdims=True))
        P_h = jnp.concatenate(ph_cols, axis=1)      # (BC, H)
        PP_h = jnp.concatenate(pph_cols, axis=1)    # (BC, H)

        # per-(row, w) sums over h  -> (BC, W); reused for w gate
        P_w = x[:, 0:W]
        PP_w = xx[:, 0:W]
        for h in range(1, H):
            P_w = P_w + x[:, h * W:(h + 1) * W]
            PP_w = PP_w + xx[:, h * W:(h + 1) * W]

        # channel stats: pooled over (H, W)  -> (BC, 1)
        s_c = jnp.sum(P_h, axis=1, keepdims=True)
        ss_c = jnp.sum(PP_h, axis=1, keepdims=True)

        # collapse the C rows of each batch  -> (B, L)
        def collapse(p):
            rows = []
            for b in range(B):
                r = p[b * C:b * C + 1, :]
                for c in range(1, C):
                    r = r + p[b * C + c:b * C + c + 1, :]
                rows.append(r)
            return jnp.concatenate(rows, axis=0)

        s_h, ss_h = collapse(P_h), collapse(PP_h)   # (B, H)
        s_w, ss_w = collapse(P_w), collapse(PP_w)   # (B, W)

        # ---- avg/std mixing (MCAGate: 0.5*(avg+std) + w0*avg + w1*std) --
        # NOTE: single-pass sum-of-squares variance (clamped); fine in f32
        # for activation-scale inputs, switch to a shifted two-pass form if
        # |mean| >> std is expected.
        def mix(s, ss, n, w0, w1):
            inv_n = 1.0 / float(n)
            inv_nm1 = 1.0 / float(max(n - 1, 1))
            mean = s * inv_n
            var = jnp.maximum(ss - float(n) * mean * mean, 0.0) * inv_nm1
            std = jnp.sqrt(var)
            return 0.5 * (mean + std) + w0 * mean + w1 * std

        mix_c = mix(s_c, ss_c, H * W, mixw_ref[0], mixw_ref[1])   # (BC, 1)
        mix_h = mix(s_h, ss_h, C * W, mixw_ref[2], mixw_ref[3])   # (B, H)
        mix_w = mix(s_w, ss_w, C * H, mixw_ref[4], mixw_ref[5])   # (B, W)

        # ---- channel-gate conv: along C (sublane rows), zero 'same'
        #      padding that never crosses a batch boundary ----------------
        kc = wc_ref.shape[0]
        pc = (kc - 1) // 2
        r_idx = jax.lax.broadcasted_iota(jnp.int32, (BC, 1), 0)
        acc_c = jnp.zeros((BC, 1), jnp.float32)
        for j in range(kc):
            t = j - pc                              # tap offset
            if t == 0:
                shifted = mix_c
            elif t > 0:
                shifted = jnp.concatenate(
                    [mix_c[t:, :], jnp.zeros((t, 1), jnp.float32)], axis=0)
            else:
                shifted = jnp.concatenate(
                    [jnp.zeros((-t, 1), jnp.float32), mix_c[:BC + t, :]], axis=0)
            # valid iff row r and row r+t lie in the same batch block
            valid = r_idx < 0                       # all-False, correct shape
            for b in range(B):
                lo, hi = b * C, (b + 1) * C
                valid = valid | ((r_idx >= max(lo, lo - t)) &
                                 (r_idx < min(hi, hi - t)))
            acc_c = acc_c + wc_ref[j] * jnp.where(valid, shifted, 0.0)
        g_c = jax.nn.sigmoid(acc_c)                 # (BC, 1)

        # ---- h / w gate convs: along the lane axis, zero 'same' padding --
        def conv1d(s, w_ref):
            k = w_ref.shape[0]
            p = (k - 1) // 2
            Bn, L = s.shape
            if p:
                z = jnp.zeros((Bn, p), s.dtype)
                sp = jnp.concatenate([z, s, z], axis=1)
            else:
                sp = s
            acc = w_ref[0] * sp[:, 0:L]
            for j in range(1, k):
                acc = acc + w_ref[j] * sp[:, j:j + L]
            return acc

        g_h = jax.nn.sigmoid(conv1d(mix_h, wh_ref))   # (B, H)
        g_w = jax.nn.sigmoid(conv1d(mix_w, ww_ref))   # (B, W)

        # ---- broadcast gates onto the (BC, HW) layout and apply ----------
        # g_hw[b, h*W + w] = g_h[b, h] + g_w[b, w]
        g_hw = jnp.concatenate([g_h[:, h:h + 1] + g_w for h in range(H)],
                               axis=1)                              # (B, HW)
        # expand each batch row to its C channel rows -> (BC, HW)
        g_rows = jnp.concatenate(
            [jnp.broadcast_to(g_hw[b:b + 1, :], (C, HW)) for b in range(B)],
            axis=0)
        # single fused expression, lane-dense store (no gate intermediate)
        o_ref[...] = x * (g_c + g_rows) * (1.0 / 3.0)

    return kernel


@jax.jit
def mca_layer(x, params):
    """Pallas implementation of MCALayer.forward (no_spatial=False)."""
    B, C, H, W = x.shape
    x2 = x.reshape(B * C, H * W).astype(jnp.float32)   # free, lane-dense view

    # sigmoid of the 2-element mixing weights hoisted to the wrapper (6 scalars)
    mixw = jnp.concatenate([
        jax.nn.sigmoid(params["weight_c"]),
        jax.nn.sigmoid(params["weight_h"]),
        jax.nn.sigmoid(params["weight_w"]),
    ]).astype(jnp.float32)                              # (6,)
    wc = params["conv_c"].reshape(-1).astype(jnp.float32)   # (kc,)
    wh = params["conv_h"].reshape(-1).astype(jnp.float32)   # (3,)
    ww = params["conv_w"].reshape(-1).astype(jnp.float32)   # (3,)

    kernel = _make_mca_kernel(B, C, H, W)
    vmem = pl.BlockSpec(memory_space=pltpu.MemorySpace.VMEM)
    smem = pl.BlockSpec(memory_space=pltpu.MemorySpace.SMEM)

    out2 = pl.pallas_call(
        kernel,
        out_shape=jax.ShapeDtypeStruct((B * C, H * W), jnp.float32),
        in_specs=[vmem, smem, smem, smem, smem],
        out_specs=vmem,
    )(x2, mixw, wc, wh, ww)
    return out2.reshape(B, C, H, W)


# --------------------------------------------------------------------------
# Pure-JAX reference for validation.
# --------------------------------------------------------------------------
def _reference(x, params):
    def gate(axes, weight2, conv_w):
        mean = jnp.mean(x, axis=axes)
        std = jnp.std(x, axis=axes, ddof=1)
        w = jax.nn.sigmoid(weight2)
        s = 0.5 * (mean + std) + w[0] * mean + w[1] * std      # (B, L)
        k = conv_w.shape[0]
        p = (k - 1) // 2
        sp = jnp.pad(s, ((0, 0), (p, p)))
        L = s.shape[1]
        out = sum(conv_w[j] * sp[:, j:j + L] for j in range(k))
        return jax.nn.sigmoid(out)

    gc = gate((2, 3), params["weight_c"], params["conv_c"])    # (B, C)
    gh = gate((1, 3), params["weight_h"], params["conv_h"])    # (B, H)
    gw = gate((1, 2), params["weight_w"], params["conv_w"])    # (B, W)
    g = gc[:, :, None, None] + gh[:, None, :, None] + gw[:, None, None, :]
    return x * g / 3.0


if __name__ == "__main__":
    B, C, H, W = 2, 4, 16, 16

    # channel-gate kernel size, exactly as in MCALayer.__init__
    lambd, gamma = 1.5, 1
    temp = round(abs((math.log2(C) - gamma) / lambd))
    kc = temp if temp % 2 else temp - 1
    assert kc >= 1

    key = jax.random.PRNGKey(0)
    ks = jax.random.split(key, 7)
    x = jax.random.normal(ks[0], (B, C, H, W), dtype=jnp.float32)

    params = {
        # MCAGate per-gate mixing parameters (torch.rand(2) analogue)
        "weight_c": jax.random.uniform(ks[1], (2,), dtype=jnp.float32),
        "weight_h": jax.random.uniform(ks[2], (2,), dtype=jnp.float32),
        "weight_w": jax.random.uniform(ks[3], (2,), dtype=jnp.float32),
        # Conv2d(1,1,(1,k), bias=False) weights, flattened to (k,)
        "conv_c": jax.random.uniform(ks[4], (kc,), minval=-0.5, maxval=0.5,
                                     dtype=jnp.float32),
        "conv_h": jax.random.uniform(ks[5], (3,), minval=-0.5, maxval=0.5,
                                     dtype=jnp.float32),
        "conv_w": jax.random.uniform(ks[6], (3,), minval=-0.5, maxval=0.5,
                                     dtype=jnp.float32),
    }

    out = mca_layer(x, params)
    out = jax.block_until_ready(out)

    ref = _reference(x, params)
    assert out.shape == (B, C, H, W)
    assert jnp.allclose(out, ref, rtol=1e-3, atol=1e-3), "mismatch vs reference"

    print("KERNEL_OK")
</pallas_src>

<mosaic_0001>
module attributes {stable_mosaic.version = 11 : i64} {
  func.func @kernel(%arg0: memref<8x256xf32, #tpu.memory_space<vmem>>, %arg1: memref<6xf32, #tpu.memory_space<smem>>, %arg2: memref<1xf32, #tpu.memory_space<smem>>, %arg3: memref<3xf32, #tpu.memory_space<smem>>, %arg4: memref<3xf32, #tpu.memory_space<smem>>, %arg5: memref<8x256xf32, #tpu.memory_space<vmem>>) attributes {dimension_semantics = [], scalar_prefetch = 0 : i64, scratch_operands = 0 : i64, tpu.core_type = #tpu.core_type<tc>} {
    %c0 = arith.constant 0 : index
    %c0_0 = arith.constant 0 : index
    %0 = vector.load %arg0[%c0, %c0_0] : memref<8x256xf32, #tpu.memory_space<vmem>>, vector<8x256xf32>
    %1 = arith.mulf %0, %0 : vector<8x256xf32>
    %2 = vector.extract_strided_slice %0 {offsets = [0, 0], sizes = [8, 16], strides = [1, 1]} : vector<8x256xf32> to vector<8x16xf32>
    %3 = vector.extract_strided_slice %1 {offsets = [0, 0], sizes = [8, 16], strides = [1, 1]} : vector<8x256xf32> to vector<8x16xf32>
    %cst = arith.constant dense<0.000000e+00> : vector<8xf32>
    %4 = vector.multi_reduction <add>, %2, %cst [1] : vector<8x16xf32> to vector<8xf32>
    %5 = vector.shape_cast %4 : vector<8xf32> to vector<8x1xf32>
    %cst_1 = arith.constant dense<0.000000e+00> : vector<8xf32>
    %6 = vector.multi_reduction <add>, %3, %cst_1 [1] : vector<8x16xf32> to vector<8xf32>
    %7 = vector.shape_cast %6 : vector<8xf32> to vector<8x1xf32>
    %8 = vector.extract_strided_slice %0 {offsets = [0, 16], sizes = [8, 16], strides = [1, 1]} : vector<8x256xf32> to vector<8x16xf32>
    %9 = vector.extract_strided_slice %1 {offsets = [0, 16], sizes = [8, 16], strides = [1, 1]} : vector<8x256xf32> to vector<8x16xf32>
    %cst_2 = arith.constant dense<0.000000e+00> : vector<8xf32>
    %10 = vector.multi_reduction <add>, %8, %cst_2 [1] : vector<8x16xf32> to vector<8xf32>
    %11 = vector.shape_cast %10 : vector<8xf32> to vector<8x1xf32>
    %cst_3 = arith.constant dense<0.000000e+00> : vector<8xf32>
    %12 = vector.multi_reduction <add>, %9, %cst_3 [1] : vector<8x16xf32> to vector<8xf32>
    %13 = vector.shape_cast %12 : vector<8xf32> to vector<8x1xf32>
    %14 = vector.extract_strided_slice %0 {offsets = [0, 32], sizes = [8, 16], strides = [1, 1]} : vector<8x256xf32> to vector<8x16xf32>
    %15 = vector.extract_strided_slice %1 {offsets = [0, 32], sizes = [8, 16], strides = [1, 1]} : vector<8x256xf32> to vector<8x16xf32>
    %cst_4 = arith.constant dense<0.000000e+00> : vector<8xf32>
    %16 = vector.multi_reduction <add>, %14, %cst_4 [1] : vector<8x16xf32> to vector<8xf32>
    %17 = vector.shape_cast %16 : vector<8xf32> to vector<8x1xf32>
    %cst_5 = arith.constant dense<0.000000e+00> : vector<8xf32>
    %18 = vector.multi_reduction <add>, %15, %cst_5 [1] : vector<8x16xf32> to vector<8xf32>
    %19 = vector.shape_cast %18 : vector<8xf32> to vector<8x1xf32>
    %20 = vector.extract_strided_slice %0 {offsets = [0, 48], sizes = [8, 16], strides = [1, 1]} : vector<8x256xf32> to vector<8x16xf32>
    %21 = vector.extract_strided_slice %1 {offsets = [0, 48], sizes = [8, 16], strides = [1, 1]} : vector<8x256xf32> to vector<8x16xf32>
    %cst_6 = arith.constant dense<0.000000e+00> : vector<8xf32>
    %22 = vector.multi_reduction <add>, %20, %cst_6 [1] : vector<8x16xf32> to vector<8xf32>
    %23 = vector.shape_cast %22 : vector<8xf32> to vector<8x1xf32>
    %cst_7 = arith.constant dense<0.000000e+00> : vector<8xf32>
    %24 = vector.multi_reduction <add>, %21, %cst_7 [1] : vector<8x16xf32> to vector<8xf32>
    %25 = vector.shape_cast %24 : vector<8xf32> to vector<8x1xf32>
    %26 = vector.extract_strided_slice %0 {offsets = [0, 64], sizes = [8, 16], strides = [1, 1]} : vector<8x256xf32> to vector<8x16xf32>
    %27 = vector.extract_strided_slice %1 {offsets = [0, 64], sizes = [8, 16], strides = [1, 1]} : vector<8x256xf32> to vector<8x16xf32>
    %cst_8 = arith.constant dense<0.000000e+00> : vector<8xf32>
    %28 = vector.multi_reduction <add>, %26, %cst_8 [1] : vector<8x16xf32> to vector<8xf32>
    %29 = vector.shape_cast %28 : vector<8xf32> to vector<8x1xf32>
    %cst_9 = arith.constant dense<0.000000e+00> : vector<8xf32>
    %30 = vector.multi_reduction <add>, %27, %cst_9 [1] : vector<8x16xf32> to vector<8xf32>
    %31 = vector.shape_cast %30 : vector<8xf32> to vector<8x1xf32>
    %32 = vector.extract_strided_slice %0 {offsets = [0, 80], sizes = [8, 16], strides = [1, 1]} : vector<8x256xf32> to vector<8x16xf32>
    %33 = vector.extract_strided_slice %1 {offsets = [0, 80], sizes = [8, 16], strides = [1, 1]} : vector<8x256xf32> to vector<8x16xf32>
    %cst_10 = arith.constant dense<0.000000e+00> : vector<8xf32>
    %34 = vector.multi_reduction <add>, %32, %cst_10 [1] : vector<8x16xf32> to vector<8xf32>
    %35 = vector.shape_cast %34 : vector<8xf32> to vector<8x1xf32>
    %cst_11 = arith.constant dense<0.000000e+00> : vector<8xf32>
    %36 = vector.multi_reduction <add>, %33, %cst_11 [1] : vector<8x16xf32> to vector<8xf32>
    %37 = vector.shape_cast %36 : vector<8xf32> to vector<8x1xf32>
    %38 = vector.extract_strided_slice %0 {offsets = [0, 96], sizes = [8, 16], strides = [1, 1]} : vector<8x256xf32> to vector<8x16xf32>
    %39 = vector.extract_strided_slice %1 {offsets = [0, 96], sizes = [8, 16], strides = [1, 1]} : vector<8x256xf32> to vector<8x16xf32>
    %cst_12 = arith.constant dense<0.000000e+00> : vector<8xf32>
    %40 = vector.multi_reduction <add>, %38, %cst_12 [1] : vector<8x16xf32> to vector<8xf32>
    %41 = vector.shape_cast %40 : vector<8xf32> to vector<8x1xf32>
    %cst_13 = arith.constant dense<0.000000e+00> : vector<8xf32>
    %42 = vector.multi_reduction <add>, %39, %cst_13 [1] : vector<8x16xf32> to vector<8xf32>
    %43 = vector.shape_cast %42 : vector<8xf32> to vector<8x1xf32>
    %44 = vector.extract_strided_slice %0 {offsets = [0, 112], sizes = [8, 16], strides = [1, 1]} : vector<8x256xf32> to vector<8x16xf32>
    %45 = vector.extract_strided_slice %1 {offsets = [0, 112], sizes = [8, 16], strides = [1, 1]} : vector<8x256xf32> to vector<8x16xf32>
    %cst_14 = arith.constant dense<0.000000e+00> : vector<8xf32>
    %46 = vector.multi_reduction <add>, %44, %cst_14 [1] : vector<8x16xf32> to vector<8xf32>
    %47 = vector.shape_cast %46 : vector<8xf32> to vector<8x1xf32>
    %cst_15 = arith.constant dense<0.000000e+00> : vector<8xf32>
    %48 = vector.multi_reduction <add>, %45, %cst_15 [1] : vector<8x16xf32> to vector<8xf32>
    %49 = vector.shape_cast %48 : vector<8xf32> to vector<8x1xf32>
    %50 = vector.extract_strided_slice %0 {offsets = [0, 128], sizes = [8, 16], strides = [1, 1]} : vector<8x256xf32> to vector<8x16xf32>
    %51 = vector.extract_strided_slice %1 {offsets = [0, 128], sizes = [8, 16], strides = [1, 1]} : vector<8x256xf32> to vector<8x16xf32>
    %cst_16 = arith.constant dense<0.000000e+00> : vector<8xf32>
    %52 = vector.multi_reduction <add>, %50, %cst_16 [1] : vector<8x16xf32> to vector<8xf32>
    %53 = vector.shape_cast %52 : vector<8xf32> to vector<8x1xf32>
    %cst_17 = arith.constant dense<0.000000e+00> : vector<8xf32>
    %54 = vector.multi_reduction <add>, %51, %cst_17 [1] : vector<8x16xf32> to vector<8xf32>
    %55 = vector.shape_cast %54 : vector<8xf32> to vector<8x1xf32>
    %56 = vector.extract_strided_slice %0 {offsets = [0, 144], sizes = [8, 16], strides = [1, 1]} : vector<8x256xf32> to vector<8x16xf32>
    %57 = vector.extract_strided_slice %1 {offsets = [0, 144], sizes = [8, 16], strides = [1, 1]} : vector<8x256xf32> to vector<8x16xf32>
    %cst_18 = arith.constant dense<0.000000e+00> : vector<8xf32>
    %58 = vector.multi_reduction <add>, %56, %cst_18 [1] : vector<8x16xf32> to vector<8xf32>
    %59 = vector.shape_cast %58 : vector<8xf32> to vector<8x1xf32>
    %cst_19 = arith.constant dense<0.000000e+00> : vector<8xf32>
    %60 = vector.multi_reduction <add>, %57, %cst_19 [1] : vector<8x16xf32> to vector<8xf32>
    %61 = vector.shape_cast %60 : vector<8xf32> to vector<8x1xf32>
    %62 = vector.extract_strided_slice %0 {offsets = [0, 160], sizes = [8, 16], strides = [1, 1]} : vector<8x256xf32> to vector<8x16xf32>
    %63 = vector.extract_strided_slice %1 {offsets = [0, 160], sizes = [8, 16], strides = [1, 1]} : vector<8x256xf32> to vector<8x16xf32>
    %cst_20 = arith.constant dense<0.000000e+00> : vector<8xf32>
    %64 = vector.multi_reduction <add>, %62, %cst_20 [1] : vector<8x16xf32> to vector<8xf32>
    %65 = vector.shape_cast %64 : vector<8xf32> to vector<8x1xf32>
    %cst_21 = arith.constant dense<0.000000e+00> : vector<8xf32>
    %66 = vector.multi_reduction <add>, %63, %cst_21 [1] : vector<8x16xf32> to vector<8xf32>
    %67 = vector.shape_cast %66 : vector<8xf32> to vector<8x1xf32>
    %68 = vector.extract_strided_slice %0 {offsets = [0, 176], sizes = [8, 16], strides = [1, 1]} : vector<8x256xf32> to vector<8x16xf32>
    %69 = vector.extract_strided_slice %1 {offsets = [0, 176], sizes = [8, 16], strides = [1, 1]} : vector<8x256xf32> to vector<8x16xf32>
    %cst_22 = arith.constant dense<0.000000e+00> : vector<8xf32>
    %70 = vector.multi_reduction <add>, %68, %cst_22 [1] : vector<8x16xf32> to vector<8xf32>
    %71 = vector.shape_cast %70 : vector<8xf32> to vector<8x1xf32>
    %cst_23 = arith.constant dense<0.000000e+00> : vector<8xf32>
    %72 = vector.multi_reduction <add>, %69, %cst_23 [1] : vector<8x16xf32> to vector<8xf32>
    %73 = vector.shape_cast %72 : vector<8xf32> to vector<8x1xf32>
    %74 = vector.extract_strided_slice %0 {offsets = [0, 192], sizes = [8, 16], strides = [1, 1]} : vector<8x256xf32> to vector<8x16xf32>
    %75 = vector.extract_strided_slice %1 {offsets = [0, 192], sizes = [8, 16], strides = [1, 1]} : vector<8x256xf32> to vector<8x16xf32>
    %cst_24 = arith.constant dense<0.000000e+00> : vector<8xf32>
    %76 = vector.multi_reduction <add>, %74, %cst_24 [1] : vector<8x16xf32> to vector<8xf32>
    %77 = vector.shape_cast %76 : vector<8xf32> to vector<8x1xf32>
    %cst_25 = arith.constant dense<0.000000e+00> : vector<8xf32>
    %78 = vector.multi_reduction <add>, %75, %cst_25 [1] : vector<8x16xf32> to vector<8xf32>
    %79 = vector.shape_cast %78 : vector<8xf32> to vector<8x1xf32>
    %80 = vector.extract_strided_slice %0 {offsets = [0, 208], sizes = [8, 16], strides = [1, 1]} : vector<8x256xf32> to vector<8x16xf32>
    %81 = vector.extract_strided_slice %1 {offsets = [0, 208], sizes = [8, 16], strides = [1, 1]} : vector<8x256xf32> to vector<8x16xf32>
    %cst_26 = arith.constant dense<0.000000e+00> : vector<8xf32>
    %82 = vector.multi_reduction <add>, %80, %cst_26 [1] : vector<8x16xf32> to vector<8xf32>
    %83 = vector.shape_cast %82 : vector<8xf32> to vector<8x1xf32>
    %cst_27 = arith.constant dense<0.000000e+00> : vector<8xf32>
    %84 = vector.multi_reduction <add>, %81, %cst_27 [1] : vector<8x16xf32> to vector<8xf32>
    %85 = vector.shape_cast %84 : vector<8xf32> to vector<8x1xf32>
    %86 = vector.extract_strided_slice %0 {offsets = [0, 224], sizes = [8, 16], strides = [1, 1]} : vector<8x256xf32> to vector<8x16xf32>
    %87 = vector.extract_strided_slice %1 {offsets = [0, 224], sizes = [8, 16], strides = [1, 1]} : vector<8x256xf32> to vector<8x16xf32>
    %cst_28 = arith.constant dense<0.000000e+00> : vector<8xf32>
    %88 = vector.multi_reduction <add>, %86, %cst_28 [1] : vector<8x16xf32> to vector<8xf32>
    %89 = vector.shape_cast %88 : vector<8xf32> to vector<8x1xf32>
    %cst_29 = arith.constant dense<0.000000e+00> : vector<8xf32>
    %90 = vector.multi_reduction <add>, %87, %cst_29 [1] : vector<8x16xf32> to vector<8xf32>
    %91 = vector.shape_cast %90 : vector<8xf32> to vector<8x1xf32>
    %92 = vector.extract_strided_slice %0 {offsets = [0, 240], sizes = [8, 16], strides = [1, 1]} : vector<8x256xf32> to vector<8x16xf32>
    %93 = vector.extract_strided_slice %1 {offsets = [0, 240], sizes = [8, 16], strides = [1, 1]} : vector<8x256xf32> to vector<8x16xf32>
    %cst_30 = arith.constant dense<0.000000e+00> : vector<8xf32>
    %94 = vector.multi_reduction <add>, %92, %cst_30 [1] : vector<8x16xf32> to vector<8xf32>
    %95 = vector.shape_cast %94 : vector<8xf32> to vector<8x1xf32>
    %cst_31 = arith.constant dense<0.000000e+00> : vector<8xf32>
    %96 = vector.multi_reduction <add>, %93, %cst_31 [1] : vector<8x16xf32> to vector<8xf32>
    %97 = vector.shape_cast %96 : vector<8xf32> to vector<8x1xf32>
    %98 = tpu.concatenate %5, %11, %17, %23, %29, %35, %41, %47, %53, %59, %65, %71, %77, %83, %89, %95 in 1 : vector<8x1xf32>, vector<8x1xf32>, vector<8x1xf32>, vector<8x1xf32>, vector<8x1xf32>, vector<8x1xf32>, vector<8x1xf32>, vector<8x1xf32>, vector<8x1xf32>, vector<8x1xf32>, vector<8x1xf32>, vector<8x1xf32>, vector<8x1xf32>, vector<8x1xf32>, vector<8x1xf32>, vector<8x1xf32> -> vector<8x16xf32>
    %99 = tpu.concatenate %7, %13, %19, %25, %31, %37, %43, %49, %55, %61, %67, %73, %79, %85, %91, %97 in 1 : vector<8x1xf32>, vector<8x1xf32>, vector<8x1xf32>, vector<8x1xf32>, vector<8x1xf32>, vector<8x1xf32>, vector<8x1xf32>, vector<8x1xf32>, vector<8x1xf32>, vector<8x1xf32>, vector<8x1xf32>, vector<8x1xf32>, vector<8x1xf32>, vector<8x1xf32>, vector<8x1xf32>, vector<8x1xf32> -> vector<8x16xf32>
    %100 = vector.extract_strided_slice %0 {offsets = [0, 0], sizes = [8, 16], strides = [1, 1]} : vector<8x256xf32> to vector<8x16xf32>
    %101 = vector.extract_strided_slice %1 {offsets = [0, 0], sizes = [8, 16], strides = [1, 1]} : vector<8x256xf32> to vector<8x16xf32>
    %102 = vector.extract_strided_slice %0 {offsets = [0, 16], sizes = [8, 16], strides = [1, 1]} : vector<8x256xf32> to vector<8x16xf32>
    %103 = arith.addf %100, %102 : vector<8x16xf32>
    %104 = vector.extract_strided_slice %1 {offsets = [0, 16], sizes = [8, 16], strides = [1, 1]} : vector<8x256xf32> to vector<8x16xf32>
    %105 = arith.addf %101, %104 : vector<8x16xf32>
    %106 = vector.extract_strided_slice %0 {offsets = [0, 32], sizes = [8, 16], strides = [1, 1]} : vector<8x256xf32> to vector<8x16xf32>
    %107 = arith.addf %103, %106 : vector<8x16xf32>
    %108 = vector.extract_strided_slice %1 {offsets = [0, 32], sizes = [8, 16], strides = [1, 1]} : vector<8x256xf32> to vector<8x16xf32>
    %109 = arith.addf %105, %108 : vector<8x16xf32>
    %110 = vector.extract_strided_slice %0 {offsets = [0, 48], sizes = [8, 16], strides = [1, 1]} : vector<8x256xf32> to vector<8x16xf32>
    %111 = arith.addf %107, %110 : vector<8x16xf32>
    %112 = vector.extract_strided_slice %1 {offsets = [0, 48], sizes = [8, 16], strides = [1, 1]} : vector<8x256xf32> to vector<8x16xf32>
    %113 = arith.addf %109, %112 : vector<8x16xf32>
    %114 = vector.extract_strided_slice %0 {offsets = [0, 64], sizes = [8, 16], strides = [1, 1]} : vector<8x256xf32> to vector<8x16xf32>
    %115 = arith.addf %111, %114 : vector<8x16xf32>
    %116 = vector.extract_strided_slice %1 {offsets = [0, 64], sizes = [8, 16], strides = [1, 1]} : vector<8x256xf32> to vector<8x16xf32>
    %117 = arith.addf %113, %116 : vector<8x16xf32>
    %118 = vector.extract_strided_slice %0 {offsets = [0, 80], sizes = [8, 16], strides = [1, 1]} : vector<8x256xf32> to vector<8x16xf32>
    %119 = arith.addf %115, %118 : vector<8x16xf32>
    %120 = vector.extract_strided_slice %1 {offsets = [0, 80], sizes = [8, 16], strides = [1, 1]} : vector<8x256xf32> to vector<8x16xf32>
    %121 = arith.addf %117, %120 : vector<8x16xf32>
    %122 = vector.extract_strided_slice %0 {offsets = [0, 96], sizes = [8, 16], strides = [1, 1]} : vector<8x256xf32> to vector<8x16xf32>
    %123 = arith.addf %119, %122 : vector<8x16xf32>
    %124 = vector.extract_strided_slice %1 {offsets = [0, 96], sizes = [8, 16], strides = [1, 1]} : vector<8x256xf32> to vector<8x16xf32>
    %125 = arith.addf %121, %124 : vector<8x16xf32>
    %126 = vector.extract_strided_slice %0 {offsets = [0, 112], sizes = [8, 16], strides = [1, 1]} : vector<8x256xf32> to vector<8x16xf32>
    %127 = arith.addf %123, %126 : vector<8x16xf32>
    %128 = vector.extract_strided_slice %1 {offsets = [0, 112], sizes = [8, 16], strides = [1, 1]} : vector<8x256xf32> to vector<8x16xf32>
    %129 = arith.addf %125, %128 : vector<8x16xf32>
    %130 = vector.extract_strided_slice %0 {offsets = [0, 128], sizes = [8, 16], strides = [1, 1]} : vector<8x256xf32> to vector<8x16xf32>
    %131 = arith.addf %127, %130 : vector<8x16xf32>
    %132 = vector.extract_strided_slice %1 {offsets = [0, 128], sizes = [8, 16], strides = [1, 1]} : vector<8x256xf32> to vector<8x16xf32>
    %133 = arith.addf %129, %132 : vector<8x16xf32>
    %134 = vector.extract_strided_slice %0 {offsets = [0, 144], sizes = [8, 16], strides = [1, 1]} : vector<8x256xf32> to vector<8x16xf32>
    %135 = arith.addf %131, %134 : vector<8x16xf32>
    %136 = vector.extract_strided_slice %1 {offsets = [0, 144], sizes = [8, 16], strides = [1, 1]} : vector<8x256xf32> to vector<8x16xf32>
    %137 = arith.addf %133, %136 : vector<8x16xf32>
    %138 = vector.extract_strided_slice %0 {offsets = [0, 160], sizes = [8, 16], strides = [1, 1]} : vector<8x256xf32> to vector<8x16xf32>
    %139 = arith.addf %135, %138 : vector<8x16xf32>
    %140 = vector.extract_strided_slice %1 {offsets = [0, 160], sizes = [8, 16], strides = [1, 1]} : vector<8x256xf32> to vector<8x16xf32>
    %141 = arith.addf %137, %140 : vector<8x16xf32>
    %142 = vector.extract_strided_slice %0 {offsets = [0, 176], sizes = [8, 16], strides = [1, 1]} : vector<8x256xf32> to vector<8x16xf32>
    %143 = arith.addf %139, %142 : vector<8x16xf32>
    %144 = vector.extract_strided_slice %1 {offsets = [0, 176], sizes = [8, 16], strides = [1, 1]} : vector<8x256xf32> to vector<8x16xf32>
    %145 = arith.addf %141, %144 : vector<8x16xf32>
    %146 = vector.extract_strided_slice %0 {offsets = [0, 192], sizes = [8, 16], strides = [1, 1]} : vector<8x256xf32> to vector<8x16xf32>
    %147 = arith.addf %143, %146 : vector<8x16xf32>
    %148 = vector.extract_strided_slice %1 {offsets = [0, 192], sizes = [8, 16], strides = [1, 1]} : vector<8x256xf32> to vector<8x16xf32>
    %149 = arith.addf %145, %148 : vector<8x16xf32>
    %150 = vector.extract_strided_slice %0 {offsets = [0, 208], sizes = [8, 16], strides = [1, 1]} : vector<8x256xf32> to vector<8x16xf32>
    %151 = arith.addf %147, %150 : vector<8x16xf32>
    %152 = vector.extract_strided_slice %1 {offsets = [0, 208], sizes = [8, 16], strides = [1, 1]} : vector<8x256xf32> to vector<8x16xf32>
    %153 = arith.addf %149, %152 : vector<8x16xf32>
    %154 = vector.extract_strided_slice %0 {offsets = [0, 224], sizes = [8, 16], strides = [1, 1]} : vector<8x256xf32> to vector<8x16xf32>
    %155 = arith.addf %151, %154 : vector<8x16xf32>
    %156 = vector.extract_strided_slice %1 {offsets = [0, 224], sizes = [8, 16], strides = [1, 1]} : vector<8x256xf32> to vector<8x16xf32>
    %157 = arith.addf %153, %156 : vector<8x16xf32>
    %158 = vector.extract_strided_slice %0 {offsets = [0, 240], sizes = [8, 16], strides = [1, 1]} : vector<8x256xf32> to vector<8x16xf32>
    %159 = arith.addf %155, %158 : vector<8x16xf32>
    %160 = vector.extract_strided_slice %1 {offsets = [0, 240], sizes = [8, 16], strides = [1, 1]} : vector<8x256xf32> to vector<8x16xf32>
    %161 = arith.addf %157, %160 : vector<8x16xf32>
    %cst_32 = arith.constant dense<0.000000e+00> : vector<8xf32>
    %162 = vector.multi_reduction <add>, %98, %cst_32 [1] : vector<8x16xf32> to vector<8xf32>
    %163 = vector.shape_cast %162 : vector<8xf32> to vector<8x1xf32>
    %cst_33 = arith.constant dense<0.000000e+00> : vector<8xf32>
    %164 = vector.multi_reduction <add>, %99, %cst_33 [1] : vector<8x16xf32> to vector<8xf32>
    %165 = vector.shape_cast %164 : vector<8xf32> to vector<8x1xf32>
    %166 = vector.extract_strided_slice %98 {offsets = [0, 0], sizes = [1, 16], strides = [1, 1]} : vector<8x16xf32> to vector<1x16xf32>
    %167 = vector.extract_strided_slice %98 {offsets = [1, 0], sizes = [1, 16], strides = [1, 1]} : vector<8x16xf32> to vector<1x16xf32>
    %168 = arith.addf %166, %167 : vector<1x16xf32>
    %169 = vector.extract_strided_slice %98 {offsets = [2, 0], sizes = [1, 16], strides = [1, 1]} : vector<8x16xf32> to vector<1x16xf32>
    %170 = arith.addf %168, %169 : vector<1x16xf32>
    %171 = vector.extract_strided_slice %98 {offsets = [3, 0], sizes = [1, 16], strides = [1, 1]} : vector<8x16xf32> to vector<1x16xf32>
    %172 = arith.addf %170, %171 : vector<1x16xf32>
    %173 = vector.extract_strided_slice %98 {offsets = [4, 0], sizes = [1, 16], strides = [1, 1]} : vector<8x16xf32> to vector<1x16xf32>
    %174 = vector.extract_strided_slice %98 {offsets = [5, 0], sizes = [1, 16], strides = [1, 1]} : vector<8x16xf32> to vector<1x16xf32>
    %175 = arith.addf %173, %174 : vector<1x16xf32>
    %176 = vector.extract_strided_slice %98 {offsets = [6, 0], sizes = [1, 16], strides = [1, 1]} : vector<8x16xf32> to vector<1x16xf32>
    %177 = arith.addf %175, %176 : vector<1x16xf32>
    %178 = vector.extract_strided_slice %98 {offsets = [7, 0], sizes = [1, 16], strides = [1, 1]} : vector<8x16xf32> to vector<1x16xf32>
    %179 = arith.addf %177, %178 : vector<1x16xf32>
    %180 = tpu.concatenate %172, %179 in 0 : vector<1x16xf32>, vector<1x16xf32> -> vector<2x16xf32>
    %181 = vector.extract_strided_slice %99 {offsets = [0, 0], sizes = [1, 16], strides = [1, 1]} : vector<8x16xf32> to vector<1x16xf32>
    %182 = vector.extract_strided_slice %99 {offsets = [1, 0], sizes = [1, 16], strides = [1, 1]} : vector<8x16xf32> to vector<1x16xf32>
    %183 = arith.addf %181, %182 : vector<1x16xf32>
    %184 = vector.extract_strided_slice %99 {offsets = [2, 0], sizes = [1, 16], strides = [1, 1]} : vector<8x16xf32> to vector<1x16xf32>
    %185 = arith.addf %183, %184 : vector<1x16xf32>
    %186 = vector.extract_strided_slice %99 {offsets = [3, 0], sizes = [1, 16], strides = [1, 1]} : vector<8x16xf32> to vector<1x16xf32>
    %187 = arith.addf %185, %186 : vector<1x16xf32>
    %188 = vector.extract_strided_slice %99 {offsets = [4, 0], sizes = [1, 16], strides = [1, 1]} : vector<8x16xf32> to vector<1x16xf32>
    %189 = vector.extract_strided_slice %99 {offsets = [5, 0], sizes = [1, 16], strides = [1, 1]} : vector<8x16xf32> to vector<1x16xf32>
    %190 = arith.addf %188, %189 : vector<1x16xf32>
    %191 = vector.extract_strided_slice %99 {offsets = [6, 0], sizes = [1, 16], strides = [1, 1]} : vector<8x16xf32> to vector<1x16xf32>
    %192 = arith.addf %190, %191 : vector<1x16xf32>
    %193 = vector.extract_strided_slice %99 {offsets = [7, 0], sizes = [1, 16], strides = [1, 1]} : vector<8x16xf32> to vector<1x16xf32>
    %194 = arith.addf %192, %193 : vector<1x16xf32>
    %195 = tpu.concatenate %187, %194 in 0 : vector<1x16xf32>, vector<1x16xf32> -> vector<2x16xf32>
    %196 = vector.extract_strided_slice %159 {offsets = [0, 0], sizes = [1, 16], strides = [1, 1]} : vector<8x16xf32> to vector<1x16xf32>
    %197 = vector.extract_strided_slice %159 {offsets = [1, 0], sizes = [1, 16], strides = [1, 1]} : vector<8x16xf32> to vector<1x16xf32>
    %198 = arith.addf %196, %197 : vector<1x16xf32>
    %199 = vector.extract_strided_slice %159 {offsets = [2, 0], sizes = [1, 16], strides = [1, 1]} : vector<8x16xf32> to vector<1x16xf32>
    %200 = arith.addf %198, %199 : vector<1x16xf32>
    %201 = vector.extract_strided_slice %159 {offsets = [3, 0], sizes = [1, 16], strides = [1, 1]} : vector<8x16xf32> to vector<1x16xf32>
    %202 = arith.addf %200, %201 : vector<1x16xf32>
    %203 = vector.extract_strided_slice %159 {offsets = [4, 0], sizes = [1, 16], strides = [1, 1]} : vector<8x16xf32> to vector<1x16xf32>
    %204 = vector.extract_strided_slice %159 {offsets = [5, 0], sizes = [1, 16], strides = [1, 1]} : vector<8x16xf32> to vector<1x16xf32>
    %205 = arith.addf %203, %204 : vector<1x16xf32>
    %206 = vector.extract_strided_slice %159 {offsets = [6, 0], sizes = [1, 16], strides = [1, 1]} : vector<8x16xf32> to vector<1x16xf32>
    %207 = arith.addf %205, %206 : vector<1x16xf32>
    %208 = vector.extract_strided_slice %159 {offsets = [7, 0], sizes = [1, 16], strides = [1, 1]} : vector<8x16xf32> to vector<1x16xf32>
    %209 = arith.addf %207, %208 : vector<1x16xf32>
    %210 = tpu.concatenate %202, %209 in 0 : vector<1x16xf32>, vector<1x16xf32> -> vector<2x16xf32>
    %211 = vector.extract_strided_slice %161 {offsets = [0, 0], sizes = [1, 16], strides = [1, 1]} : vector<8x16xf32> to vector<1x16xf32>
    %212 = vector.extract_strided_slice %161 {offsets = [1, 0], sizes = [1, 16], strides = [1, 1]} : vector<8x16xf32> to vector<1x16xf32>
    %213 = arith.addf %211, %212 : vector<1x16xf32>
    %214 = vector.extract_strided_slice %161 {offsets = [2, 0], sizes = [1, 16], strides = [1, 1]} : vector<8x16xf32> to vector<1x16xf32>
    %215 = arith.addf %213, %214 : vector<1x16xf32>
    %216 = vector.extract_strided_slice %161 {offsets = [3, 0], sizes = [1, 16], strides = [1, 1]} : vector<8x16xf32> to vector<1x16xf32>
    %217 = arith.addf %215, %216 : vector<1x16xf32>
    %218 = vector.extract_strided_slice %161 {offsets = [4, 0], sizes = [1, 16], strides = [1, 1]} : vector<8x16xf32> to vector<1x16xf32>
    %219 = vector.extract_strided_slice %161 {offsets = [5, 0], sizes = [1, 16], strides = [1, 1]} : vector<8x16xf32> to vector<1x16xf32>
    %220 = arith.addf %218, %219 : vector<1x16xf32>
    %221 = vector.extract_strided_slice %161 {offsets = [6, 0], sizes = [1, 16], strides = [1, 1]} : vector<8x16xf32> to vector<1x16xf32>
    %222 = arith.addf %220, %221 : vector<1x16xf32>
    %223 = vector.extract_strided_slice %161 {offsets = [7, 0], sizes = [1, 16], strides = [1, 1]} : vector<8x16xf32> to vector<1x16xf32>
    %224 = arith.addf %222, %223 : vector<1x16xf32>
    %225 = tpu.concatenate %217, %224 in 0 : vector<1x16xf32>, vector<1x16xf32> -> vector<2x16xf32>
    %c0_34 = arith.constant 0 : index
    %226 = memref.load %arg1[%c0_34] : memref<6xf32, #tpu.memory_space<smem>>
    %c1 = arith.constant 1 : index
    %227 = memref.load %arg1[%c1] : memref<6xf32, #tpu.memory_space<smem>>
    %cst_35 = arith.constant 3.906250e-03 : f32
    %228 = vector.broadcast %cst_35 : f32 to vector<8x1xf32>
    %229 = arith.mulf %163, %228 : vector<8x1xf32>
    %cst_36 = arith.constant 2.560000e+02 : f32
    %230 = vector.broadcast %cst_36 : f32 to vector<8x1xf32>
    %231 = arith.mulf %230, %229 : vector<8x1xf32>
    %232 = arith.mulf %231, %229 : vector<8x1xf32>
    %233 = arith.subf %165, %232 : vector<8x1xf32>
    %cst_37 = arith.constant 0.000000e+00 : f32
    %234 = vector.broadcast %cst_37 : f32 to vector<8x1xf32>
    %235 = arith.maximumf %233, %234 : vector<8x1xf32>
    %cst_38 = arith.constant 0.00392156886 : f32
    %236 = vector.broadcast %cst_38 : f32 to vector<8x1xf32>
    %237 = arith.mulf %235, %236 : vector<8x1xf32>
    %238 = math.sqrt %237 : vector<8x1xf32>
    %239 = arith.addf %229, %238 : vector<8x1xf32>
    %cst_39 = arith.constant 5.000000e-01 : f32
    %240 = vector.broadcast %cst_39 : f32 to vector<8x1xf32>
    %241 = arith.mulf %240, %239 : vector<8x1xf32>
    %242 = vector.broadcast %226 : f32 to vector<8x1xf32>
    %243 = arith.mulf %242, %229 : vector<8x1xf32>
    %244 = arith.addf %241, %243 : vector<8x1xf32>
    %245 = vector.broadcast %227 : f32 to vector<8x1xf32>
    %246 = arith.mulf %245, %238 : vector<8x1xf32>
    %247 = arith.addf %244, %246 : vector<8x1xf32>
    %c2 = arith.constant 2 : index
    %248 = memref.load %arg1[%c2] : memref<6xf32, #tpu.memory_space<smem>>
    %c3 = arith.constant 3 : index
    %249 = memref.load %arg1[%c3] : memref<6xf32, #tpu.memory_space<smem>>
    %cst_40 = arith.constant 1.562500e-02 : f32
    %250 = vector.broadcast %cst_40 : f32 to vector<2x16xf32>
    %251 = arith.mulf %180, %250 : vector<2x16xf32>
    %cst_41 = arith.constant 6.400000e+01 : f32
    %252 = vector.broadcast %cst_41 : f32 to vector<2x16xf32>
    %253 = arith.mulf %252, %251 : vector<2x16xf32>
    %254 = arith.mulf %253, %251 : vector<2x16xf32>
    %255 = arith.subf %195, %254 : vector<2x16xf32>
    %cst_42 = arith.constant 0.000000e+00 : f32
    %256 = vector.broadcast %cst_42 : f32 to vector<2x16xf32>
    %257 = arith.maximumf %255, %256 : vector<2x16xf32>
    %cst_43 = arith.constant 0.0158730168 : f32
    %258 = vector.broadcast %cst_43 : f32 to vector<2x16xf32>
    %259 = arith.mulf %257, %258 : vector<2x16xf32>
    %260 = math.sqrt %259 : vector<2x16xf32>
    %261 = arith.addf %251, %260 : vector<2x16xf32>
    %cst_44 = arith.constant 5.000000e-01 : f32
    %262 = vector.broadcast %cst_44 : f32 to vector<2x16xf32>
    %263 = arith.mulf %262, %261 : vector<2x16xf32>
    %264 = vector.broadcast %248 : f32 to vector<2x16xf32>
    %265 = arith.mulf %264, %251 : vector<2x16xf32>
    %266 = arith.addf %263, %265 : vector<2x16xf32>
    %267 = vector.broadcast %249 : f32 to vector<2x16xf32>
    %268 = arith.mulf %267, %260 : vector<2x16xf32>
    %269 = arith.addf %266, %268 : vector<2x16xf32>
    %c4 = arith.constant 4 : index
    %270 = memref.load %arg1[%c4] : memref<6xf32, #tpu.memory_space<smem>>
    %c5 = arith.constant 5 : index
    %271 = memref.load %arg1[%c5] : memref<6xf32, #tpu.memory_space<smem>>
    %cst_45 = arith.constant 1.562500e-02 : f32
    %272 = vector.broadcast %cst_45 : f32 to vector<2x16xf32>
    %273 = arith.mulf %210, %272 : vector<2x16xf32>
    %cst_46 = arith.constant 6.400000e+01 : f32
    %274 = vector.broadcast %cst_46 : f32 to vector<2x16xf32>
    %275 = arith.mulf %274, %273 : vector<2x16xf32>
    %276 = arith.mulf %275, %273 : vector<2x16xf32>
    %277 = arith.subf %225, %276 : vector<2x16xf32>
    %cst_47 = arith.constant 0.000000e+00 : f32
    %278 = vector.broadcast %cst_47 : f32 to vector<2x16xf32>
    %279 = arith.maximumf %277, %278 : vector<2x16xf32>
    %cst_48 = arith.constant 0.0158730168 : f32
    %280 = vector.broadcast %cst_48 : f32 to vector<2x16xf32>
    %281 = arith.mulf %279, %280 : vector<2x16xf32>
    %282 = math.sqrt %281 : vector<2x16xf32>
    %283 = arith.addf %273, %282 : vector<2x16xf32>
    %cst_49 = arith.constant 5.000000e-01 : f32
    %284 = vector.broadcast %cst_49 : f32 to vector<2x16xf32>
    %285 = arith.mulf %284, %283 : vector<2x16xf32>
    %286 = vector.broadcast %270 : f32 to vector<2x16xf32>
    %287 = arith.mulf %286, %273 : vector<2x16xf32>
    %288 = arith.addf %285, %287 : vector<2x16xf32>
    %289 = vector.broadcast %271 : f32 to vector<2x16xf32>
    %290 = arith.mulf %289, %282 : vector<2x16xf32>
    %291 = arith.addf %288, %290 : vector<2x16xf32>
    %292 = tpu.iota {dimensions = array<i32: 0>} : vector<8x1xi32>
    %cst_50 = arith.constant 0.000000e+00 : f32
    %293 = vector.broadcast %cst_50 : f32 to vector<8x1xf32>
    %c0_i32 = arith.constant 0 : i32
    %294 = vector.broadcast %c0_i32 : i32 to vector<8x1xi32>
    %295 = arith.cmpi slt, %292, %294 : vector<8x1xi32>
    %c0_i32_51 = arith.constant 0 : i32
    %296 = vector.broadcast %c0_i32_51 : i32 to vector<8x1xi32>
    %297 = arith.cmpi sge, %292, %296 : vector<8x1xi32>
    %c4_i32 = arith.constant 4 : i32
    %298 = vector.broadcast %c4_i32 : i32 to vector<8x1xi32>
    %299 = arith.cmpi slt, %292, %298 : vector<8x1xi32>
    %300 = arith.andi %297, %299 : vector<8x1xi1>
    %301 = arith.ori %295, %300 : vector<8x1xi1>
    %c4_i32_52 = arith.constant 4 : i32
    %302 = vector.broadcast %c4_i32_52 : i32 to vector<8x1xi32>
    %303 = arith.cmpi sge, %292, %302 : vector<8x1xi32>
    %c8_i32 = arith.constant 8 : i32
    %304 = vector.broadcast %c8_i32 : i32 to vector<8x1xi32>
    %305 = arith.cmpi slt, %292, %304 : vector<8x1xi32>
    %306 = arith.andi %303, %305 : vector<8x1xi1>
    %307 = arith.ori %301, %306 : vector<8x1xi1>
    %c0_53 = arith.constant 0 : index
    %308 = memref.load %arg2[%c0_53] : memref<1xf32, #tpu.memory_space<smem>>
    %cst_54 = arith.constant 0.000000e+00 : f32
    %309 = vector.broadcast %cst_54 : f32 to vector<8x1xf32>
    %310 = arith.select %307, %247, %309 : vector<8x1xi1>, vector<8x1xf32>
    %311 = vector.broadcast %308 : f32 to vector<8x1xf32>
    %312 = arith.mulf %311, %310 : vector<8x1xf32>
    %313 = arith.addf %293, %312 : vector<8x1xf32>
    %314 = arith.negf %313 : vector<8x1xf32>
    %315 = math.exp %314 : vector<8x1xf32>
    %cst_55 = arith.constant 1.000000e+00 : f32
    %316 = vector.broadcast %cst_55 : f32 to vector<8x1xf32>
    %317 = arith.addf %316, %315 : vector<8x1xf32>
    %318 = arith.divf %316, %317 : vector<8x1xf32>
    %cst_56 = arith.constant 0.000000e+00 : f32
    %319 = vector.broadcast %cst_56 : f32 to vector<2x1xf32>
    %320 = tpu.concatenate %319, %269, %319 in 1 : vector<2x1xf32>, vector<2x16xf32>, vector<2x1xf32> -> vector<2x18xf32>
    %c0_57 = arith.constant 0 : index
    %321 = memref.load %arg3[%c0_57] : memref<3xf32, #tpu.memory_space<smem>>
    %322 = vector.extract_strided_slice %320 {offsets = [0, 0], sizes = [2, 16], strides = [1, 1]} : vector<2x18xf32> to vector<2x16xf32>
    %323 = vector.broadcast %321 : f32 to vector<2x16xf32>
    %324 = arith.mulf %323, %322 : vector<2x16xf32>
    %c1_58 = arith.constant 1 : index
    %325 = memref.load %arg3[%c1_58] : memref<3xf32, #tpu.memory_space<smem>>
    %326 = vector.extract_strided_slice %320 {offsets = [0, 1], sizes = [2, 16], strides = [1, 1]} : vector<2x18xf32> to vector<2x16xf32>
    %327 = vector.broadcast %325 : f32 to vector<2x16xf32>
    %328 = arith.mulf %327, %326 : vector<2x16xf32>
    %329 = arith.addf %324, %328 : vector<2x16xf32>
    %c2_59 = arith.constant 2 : index
    %330 = memref.load %arg3[%c2_59] : memref<3xf32, #tpu.memory_space<smem>>
    %331 = vector.extract_strided_slice %320 {offsets = [0, 2], sizes = [2, 16], strides = [1, 1]} : vector<2x18xf32> to vector<2x16xf32>
    %332 = vector.broadcast %330 : f32 to vector<2x16xf32>
    %333 = arith.mulf %332, %331 : vector<2x16xf32>
    %334 = arith.addf %329, %333 : vector<2x16xf32>
    %335 = arith.negf %334 : vector<2x16xf32>
    %336 = math.exp %335 : vector<2x16xf32>
    %cst_60 = arith.constant 1.000000e+00 : f32
    %337 = vector.broadcast %cst_60 : f32 to vector<2x16xf32>
    %338 = arith.addf %337, %336 : vector<2x16xf32>
    %339 = arith.divf %337, %338 : vector<2x16xf32>
    %cst_61 = arith.constant 0.000000e+00 : f32
    %340 = vector.broadcast %cst_61 : f32 to vector<2x1xf32>
    %341 = tpu.concatenate %340, %291, %340 in 1 : vector<2x1xf32>, vector<2x16xf32>, vector<2x1xf32> -> vector<2x18xf32>
    %c0_62 = arith.constant 0 : index
    %342 = memref.load %arg4[%c0_62] : memref<3xf32, #tpu.memory_space<smem>>
    %343 = vector.extract_strided_slice %341 {offsets = [0, 0], sizes = [2, 16], strides = [1, 1]} : vector<2x18xf32> to vector<2x16xf32>
    %344 = vector.broadcast %342 : f32 to vector<2x16xf32>
    %345 = arith.mulf %344, %343 : vector<2x16xf32>
    %c1_63 = arith.constant 1 : index
    %346 = memref.load %arg4[%c1_63] : memref<3xf32, #tpu.memory_space<smem>>
    %347 = vector.extract_strided_slice %341 {offsets = [0, 1], sizes = [2, 16], strides = [1, 1]} : vector<2x18xf32> to vector<2x16xf32>
    %348 = vector.broadcast %346 : f32 to vector<2x16xf32>
    %349 = arith.mulf %348, %347 : vector<2x16xf32>
    %350 = arith.addf %345, %349 : vector<2x16xf32>
    %c2_64 = arith.constant 2 : index
    %351 = memref.load %arg4[%c2_64] : memref<3xf32, #tpu.memory_space<smem>>
    %352 = vector.extract_strided_slice %341 {offsets = [0, 2], sizes = [2, 16], strides = [1, 1]} : vector<2x18xf32> to vector<2x16xf32>
    %353 = vector.broadcast %351 : f32 to vector<2x16xf32>
    %354 = arith.mulf %353, %352 : vector<2x16xf32>
    %355 = arith.addf %350, %354 : vector<2x16xf32>
    %356 = arith.negf %355 : vector<2x16xf32>
    %357 = math.exp %356 : vector<2x16xf32>
    %cst_65 = arith.constant 1.000000e+00 : f32
    %358 = vector.broadcast %cst_65 : f32 to vector<2x16xf32>
    %359 = arith.addf %358, %357 : vector<2x16xf32>
    %360 = arith.divf %358, %359 : vector<2x16xf32>
    %361 = vector.extract_strided_slice %339 {offsets = [0, 0], sizes = [2, 1], strides = [1, 1]} : vector<2x16xf32> to vector<2x1xf32>
    %362 = vector.broadcast %361 : vector<2x1xf32> to vector<2x16xf32>
    %363 = arith.addf %362, %360 : vector<2x16xf32>
    %364 = vector.extract_strided_slice %339 {offsets = [0, 1], sizes = [2, 1], strides = [1, 1]} : vector<2x16xf32> to vector<2x1xf32>
    %365 = vector.broadcast %364 : vector<2x1xf32> to vector<2x16xf32>
    %366 = arith.addf %365, %360 : vector<2x16xf32>
    %367 = vector.extract_strided_slice %339 {offsets = [0, 2], sizes = [2, 1], strides = [1, 1]} : vector<2x16xf32> to vector<2x1xf32>
    %368 = vector.broadcast %367 : vector<2x1xf32> to vector<2x16xf32>
    %369 = arith.addf %368, %360 : vector<2x16xf32>
    %370 = vector.extract_strided_slice %339 {offsets = [0, 3], sizes = [2, 1], strides = [1, 1]} : vector<2x16xf32> to vector<2x1xf32>
    %371 = vector.broadcast %370 : vector<2x1xf32> to vector<2x16xf32>
    %372 = arith.addf %371, %360 : vector<2x16xf32>
    %373 = vector.extract_strided_slice %339 {offsets = [0, 4], sizes = [2, 1], strides = [1, 1]} : vector<2x16xf32> to vector<2x1xf32>
    %374 = vector.broadcast %373 : vector<2x1xf32> to vector<2x16xf32>
    %375 = arith.addf %374, %360 : vector<2x16xf32>
    %376 = vector.extract_strided_slice %339 {offsets = [0, 5], sizes = [2, 1], strides = [1, 1]} : vector<2x16xf32> to vector<2x1xf32>
    %377 = vector.broadcast %376 : vector<2x1xf32> to vector<2x16xf32>
    %378 = arith.addf %377, %360 : vector<2x16xf32>
    %379 = vector.extract_strided_slice %339 {offsets = [0, 6], sizes = [2, 1], strides = [1, 1]} : vector<2x16xf32> to vector<2x1xf32>
    %380 = vector.broadcast %379 : vector<2x1xf32> to vector<2x16xf32>
    %381 = arith.addf %380, %360 : vector<2x16xf32>
    %382 = vector.extract_strided_slice %339 {offsets = [0, 7], sizes = [2, 1], strides = [1, 1]} : vector<2x16xf32> to vector<2x1xf32>
    %383 = vector.broadcast %382 : vector<2x1xf32> to vector<2x16xf32>
    %384 = arith.addf %383, %360 : vector<2x16xf32>
    %385 = vector.extract_strided_slice %339 {offsets = [0, 8], sizes = [2, 1], strides = [1, 1]} : vector<2x16xf32> to vector<2x1xf32>
    %386 = vector.broadcast %385 : vector<2x1xf32> to vector<2x16xf32>
    %387 = arith.addf %386, %360 : vector<2x16xf32>
    %388 = vector.extract_strided_slice %339 {offsets = [0, 9], sizes = [2, 1], strides = [1, 1]} : vector<2x16xf32> to vector<2x1xf32>
    %389 = vector.broadcast %388 : vector<2x1xf32> to vector<2x16xf32>
    %390 = arith.addf %389, %360 : vector<2x16xf32>
    %391 = vector.extract_strided_slice %339 {offsets = [0, 10], sizes = [2, 1], strides = [1, 1]} : vector<2x16xf32> to vector<2x1xf32>
    %392 = vector.broadcast %391 : vector<2x1xf32> to vector<2x16xf32>
    %393 = arith.addf %392, %360 : vector<2x16xf32>
    %394 = vector.extract_strided_slice %339 {offsets = [0, 11], sizes = [2, 1], strides = [1, 1]} : vector<2x16xf32> to vector<2x1xf32>
    %395 = vector.broadcast %394 : vector<2x1xf32> to vector<2x16xf32>
    %396 = arith.addf %395, %360 : vector<2x16xf32>
    %397 = vector.extract_strided_slice %339 {offsets = [0, 12], sizes = [2, 1], strides = [1, 1]} : vector<2x16xf32> to vector<2x1xf32>
    %398 = vector.broadcast %397 : vector<2x1xf32> to vector<2x16xf32>
    %399 = arith.addf %398, %360 : vector<2x16xf32>
    %400 = vector.extract_strided_slice %339 {offsets = [0, 13], sizes = [2, 1], strides = [1, 1]} : vector<2x16xf32> to vector<2x1xf32>
    %401 = vector.broadcast %400 : vector<2x1xf32> to vector<2x16xf32>
    %402 = arith.addf %401, %360 : vector<2x16xf32>
    %403 = vector.extract_strided_slice %339 {offsets = [0, 14], sizes = [2, 1], strides = [1, 1]} : vector<2x16xf32> to vector<2x1xf32>
    %404 = vector.broadcast %403 : vector<2x1xf32> to vector<2x16xf32>
    %405 = arith.addf %404, %360 : vector<2x16xf32>
    %406 = vector.extract_strided_slice %339 {offsets = [0, 15], sizes = [2, 1], strides = [1, 1]} : vector<2x16xf32> to vector<2x1xf32>
    %407 = vector.broadcast %406 : vector<2x1xf32> to vector<2x16xf32>
    %408 = arith.addf %407, %360 : vector<2x16xf32>
    %409 = tpu.concatenate %363, %366, %369, %372, %375, %378, %381, %384, %387, %390, %393, %396, %399, %402, %405, %408 in 1 : vector<2x16xf32>, vector<2x16xf32>, vector<2x16xf32>, vector<2x16xf32>, vector<2x16xf32>, vector<2x16xf32>, vector<2x16xf32>, vector<2x16xf32>, vector<2x16xf32>, vector<2x16xf32>, vector<2x16xf32>, vector<2x16xf32>, vector<2x16xf32>, vector<2x16xf32>, vector<2x16xf32>, vector<2x16xf32> -> vector<2x256xf32>
    %410 = vector.extract_strided_slice %409 {offsets = [0, 0], sizes = [1, 256], strides = [1, 1]} : vector<2x256xf32> to vector<1x256xf32>
    %411 = vector.shape_cast %410 : vector<1x256xf32> to vector<1x256xf32>
    %412 = vector.broadcast %411 : vector<1x256xf32> to vector<4x256xf32>
    %413 = vector.extract_strided_slice %409 {offsets = [1, 0], sizes = [1, 256], strides = [1, 1]} : vector<2x256xf32> to vector<1x256xf32>
    %414 = vector.shape_cast %413 : vector<1x256xf32> to vector<1x256xf32>
    %415 = vector.broadcast %414 : vector<1x256xf32> to vector<4x256xf32>
    %416 = tpu.concatenate %412, %415 in 0 : vector<4x256xf32>, vector<4x256xf32> -> vector<8x256xf32>
    %417 = vector.broadcast %318 : vector<8x1xf32> to vector<8x256xf32>
    %418 = arith.addf %417, %416 : vector<8x256xf32>
    %419 = arith.mulf %0, %418 : vector<8x256xf32>
    %cst_66 = arith.constant 0.333333343 : f32
    %420 = vector.broadcast %cst_66 : f32 to vector<8x256xf32>
    %421 = arith.mulf %419, %420 : vector<8x256xf32>
    %c0_67 = arith.constant 0 : index
    %c0_68 = arith.constant 0 : index
    %422 = vector.load %arg5[%c0_67, %c0_68] : memref<8x256xf32, #tpu.memory_space<vmem>>, vector<8x256xf32>
    tpu.vector_store %arg5[%c0_67, %c0_68], %421 {strides = array<i32>} : memref<8x256xf32, #tpu.memory_space<vmem>>, vector<8x256xf32>,
    return
  }
}

</mosaic_0001>

<bundles_post_ra>
// kernel: mca_layer.1
= control target key start
LH: loop header
LB: loop body
LE: loop exit
PB: predicated region body
PF: predicated region fallthrough
CT: control target
= control target key end

     0   :  { %11 = vsyncpa [#allocation4], 0  ;;  %s1168_s0 = inlined_call_operand.vmem [shape: f32[8,256], index: 0, kind: input, shape index: {}]   ;;  %s1169_s1 = inlined_call_operand.vmem [shape: f32[6], index: 1, kind: input, shape index: {}]   ;;  %s1170_s2 = inlined_call_operand.<no memory space> [shape: f32[1], index: 2, kind: input, shape index: {}]   ;;  %s1171_s3 = inlined_call_operand.vmem [shape: f32[3], index: 3, kind: input, shape index: {}]   ;;  %s1172_s4 = inlined_call_operand.vmem [shape: f32[3], index: 4, kind: input, shape index: {}]   ;;  %s1173_s5 = inlined_call_operand.vmem [shape: f32[8,256], index: 5, kind: output, shape index: {}]  }
   0x1   :  { %12 = vsyncpa [#allocation6], 0  ;;  %s33_s20 = sshll.u32 %s1171_s3, 4  ;;  %s21_s23 = sshll.u32 %s1169_s1, 4  ;;  %s34_s20 = int_to_ptr.vmem [resolvable:$true] %s33_s20  ;;  %s22_s23 = int_to_ptr.vmem [resolvable:$true] %s21_s23 }
   0x2   :  { %s805_s24 = scalar_lea.vmem %s34_s20, 16  ;;  %p810_p1 = scmp.lt.s32.totalorder %s34_s20, %s34_s20 }
   0x3   :  { %p806_p0 = scmp.ne.s32.totalorder %s34_s20, %s805_s24  ;;  %p811_p2 = scmp.lt.s32.totalorder %s805_s24, %s805_s24 }
   0x5   :  { %p812_p3 = por %p811_p2, %p810_p1 }
   0x7   :  { %p813_p4 = pnand %p812_p3, %p806_p0 }
   0x9   :  { %816 = shalt.err (!%p813_p4)
}
   0xa   :  { %s845_s25 = smov [#allocation5]   ;;  %s817_s26 = scalar_lea.vmem %s22_s23, 16 }
   0xb   :  { %36 = dma.vmem_to_smem %s34_s20, 16, %s845_s25, [#allocation6]  }
   0xc   :  { %p818_p5 = scmp.ne.s32.totalorder %s22_s23, %s817_s26  ;;  %p822_p6 = scmp.lt.s32.totalorder %s22_s23, %s22_s23 }
   0xd   :  { %p823_p7 = scmp.lt.s32.totalorder %s817_s26, %s817_s26 }
   0xf   :  { %p824_p8 = por %p823_p7, %p822_p6 }
  0x11   :  { %p825_p9 = pnand %p824_p8, %p818_p5 }
  0x13   :  { %828 = shalt.err (!%p825_p9)
}
  0x14   :  { %s846_s3 = smov [#allocation3]   ;;  %s43_s28 = sshll.u32 %s1172_s4, 4  ;;  %s44_s28 = int_to_ptr.vmem [resolvable:$true] %s43_s28 }
  0x15   :  { %24 = dma.vmem_to_smem %s22_s23, 16, %s846_s3, [#allocation4]  }
  0x16   :  { %s829_s29 = scalar_lea.vmem %s44_s28, 16  ;;  %p834_p11 = scmp.lt.s32.totalorder %s44_s28, %s44_s28 }
  0x17   :  { %p830_p10 = scmp.ne.s32.totalorder %s44_s28, %s829_s29  ;;  %p835_p12 = scmp.lt.s32.totalorder %s829_s29, %s829_s29 }
  0x19   :  { %p836_p13 = por %p835_p12, %p834_p11 }
  0x1b   :  { %p837_p0 = pnand %p836_p13, %p830_p10 }
  0x1d   :  { %840 = shalt.err (!%p837_p0)
}
  0x1e   :  { %s847_s30 = smov [#allocation7]  }
  0x1f   :  { %46 = dma.vmem_to_smem %s44_s28, 16, %s847_s30, [#allocation6]  }
  0x20   :  { %841 = dma.done.wait [#allocation4], 16  }
  0x21   :  { %842 = vsyncadd [#allocation4], 4294967280 }
  0x22   :  { %843 = dma.done.wait [#allocation6], 32  }
  0x23   :  { %844 = vsyncadd [#allocation6], 4294967264 }
  0x24   :  { %56 = sfence }
  0x25   :  { %v916_v0 = vld [vmem:[%s1168_s0] sm:$0xff]  ;;  %vm61_vm0 = vcmask 130048   ;;  %s848_s4 = smov 112   ;;  %s849_s8 = smov 96   ;;  %vm246_vm1 = vcmask 7168   ;;  %vm248_vm2 = vcmask 15360  }
  0x26   :  { %69 = vrot.lane.b32.xlu1 %v916_v0, %s848_s4  ;;  %v62_v1 = vsel %vm61_vm0, %v916_v0, 0.0  ;;  %v924_v2 = vmul.f32 %v916_v0, %v916_v0  ;;  %s850_s9 = smov 80   ;;  %s851_s10 = smov 64   ;;  %vm250_vm3 = vcmask 23552   ;;  %vm252_vm4 = vcmask 31744   ;;  %v1003_v50 = vld [vmem:[%s1168_s0 + $0x8] sm:$0xff] }
  0x27   :  { %63 = vadd.xlane.f32.xlu0 %v62_v1  ;;  %s852_s11 = smov 48   ;;  %s853_s12 = smov 32   ;;  %vm254_vm5 = vcmask 39936   ;;  %vm256_vm6 = vcmask 48128   ;;  %v154_v51 = vsel %vm61_vm0, %v1003_v50, 0.0  ;;  %v60_v52 = vmul.f32 %v1003_v50, %v1003_v50 }
  0x28   :  { %v65_v3 = vsel %vm61_vm0, %v924_v2, 0.0  ;;  %s854_s13 = smov 16   ;;  %vm258_vm7 = vcmask 56320   ;;  %vm260_vm8 = vcmask 64512   ;;  %vm262_vm9 = vcmask 72704   ;;  %s731_s16 = sld [smem:[#allocation3 + $0x4]] }
  0x29   :  { %v157_v53 = vsel %vm61_vm0, %v60_v52, 0.0  ;;  %vm340_vm10 = vcmask 1040384   ;;  %s732_s17 = sld [smem:[#allocation3 + $0x5]]  ;;  %vm264_vm13 = vcmask 80896   ;;  %vm266_vm14 = vcmask 89088   ;;  %s855_s20 = smov 1  }
  0x2a   :  { %82 = vrot.lane.b32.xlu1 %v916_v0, %s849_s8  ;;  %vm268_vm15 = vcmask 97280   ;;  %s729_s18 = sld [smem:[#allocation3 + $0x2]]  ;;  %s856_s25 = smov 127  }
  0x2b   :  { %66 = vadd.xlane.f32.xlu0 %v65_v3  ;;  %s730_s19 = sld [smem:[#allocation3 + $0x3]]  ;;  %s857_s26 = smov 126  }
  0x2c   :  { %s734_s21 = sld [smem:[#allocation5 + $0x1]] }
  0x2d   :  { %s735_s22 = sld [smem:[#allocation5 + $0x2]] }
  0x2e   :  { %94 = vrot.lane.b32.xlu1 %v916_v0, %s850_s9  ;;  %s738_s23 = sld [smem:[#allocation7 + $0x2]] }
  0x2f   :  { %s737_s24 = sld [smem:[#allocation7 + $0x1]] }
  0x30   :  { %s482_s3 = sld [smem:[#allocation5]] }
  0x31   :  { %s513_s1 = sld [smem:[#allocation7]] }
  0x32   :  { %s384_s27 = sld [smem:[#allocation3]] }
  0x33   :  { %s728_s28 = sld [smem:[#allocation3 + $0x1]] }
  0x41   :  { %76 = vrot.lane.b32.xlu0 %v924_v2, %s848_s4 }
  0x45   :  { %88 = vrot.lane.b32.xlu0 %v924_v2, %s849_s8 }
  0x98   :  { %v936_v4 = vpop.permute.xlu1 %69 }
  0x99   :  { %v72_v5 = vsel %vm61_vm0, %v936_v4, 0.0 }
  0x9a   :  { %73 = vadd.xlane.f32.xlu1 %v72_v5 }
  0x9c   :  { %v940_v6 = vpop.permute.xlu1 %82 }
  0x9d   :  { %v85_v7 = vsel %vm61_vm0, %v940_v6, 0.0 }
  0x9e   :  { %86 = vadd.xlane.f32.xlu1 %v85_v7 }
  0xa0   :  { %v944_v8 = vpop.permute.xlu1 %94 }
  0xa1   :  { %v97_v9 = vsel %vm61_vm0, %v944_v8, 0.0 }
  0xa2   :  { %98 = vadd.xlane.f32.xlu1 %v97_v9 }
  0xb0   :  { %v64_v10 = vpop.xlane.xlu0 %63 }
  0xb3   :  { %106 = vrot.lane.b32.xlu1 %v916_v0, %s851_s10 }
  0xb4   :  { %v67_v11 = vpop.xlane.xlu0 %66 }
  0xb8   :  { %v950_v12 = vpop.permute.xlu0 %76 }
  0xb9   :  { %v79_v13 = vsel %vm61_vm0, %v950_v12, 0.0  ;;  %v292_v5 = vadd.f32 %v950_v12, %v924_v2 }
  0xba   :  { %80 = vadd.xlane.f32.xlu0 %v79_v13 }
  0xbc   :  { %v954_v14 = vpop.permute.xlu0 %88 }
  0xbd   :  { %v91_v15 = vsel %vm61_vm0, %v954_v14, 0.0  ;;  %v294_v7 = vadd.f32 %v292_v5, %v954_v14 }
  0xbe   :  { %92 = vadd.xlane.f32.xlu0 %v91_v15 }
  0xd4   :  { %100 = vrot.lane.b32.xlu0 %v924_v2, %s850_s9 }
 0x123   :  { %v74_v16 = vpop.xlane.xlu1 %73 }
 0x124   :  { %v247_v27 = vsel %vm246_vm1, %v64_v10, %v74_v16 }
 0x127   :  { %v87_v17 = vpop.xlane.xlu1 %86 }
 0x128   :  { %v249_v28 = vsel %vm248_vm2, %v247_v27, %v87_v17 }
 0x12b   :  { %v99_v18 = vpop.xlane.xlu1 %98 }
 0x12c   :  { %v251_v29 = vsel %vm250_vm3, %v249_v28, %v99_v18  ;;  %v291_v28 = vadd.f32 %v936_v4, %v916_v0 }
 0x12f   :  { %v960_v19 = vpop.permute.xlu1 %106 }
 0x130   :  { %v109_v20 = vsel %vm61_vm0, %v960_v19, 0.0 }
 0x131   :  { %110 = vadd.xlane.f32.xlu1 %v109_v20 }
 0x142   :  { %118 = vrot.lane.b32.xlu1 %v916_v0, %s852_s11 }
 0x143   :  { %v81_v21 = vpop.xlane.xlu0 %80 }
 0x144   :  { %v276_v22 = vsel %vm246_vm1, %v67_v11, %v81_v21 }
 0x147   :  { %v93_v23 = vpop.xlane.xlu0 %92 }
 0x148   :  { %v277_v24 = vsel %vm248_vm2, %v276_v22, %v93_v23  ;;  %vm270_vm2 = vcmask 105472  }
 0x14b   :  { %v967_v25 = vpop.permute.xlu0 %100 }
 0x14c   :  { %v103_v26 = vsel %vm61_vm0, %v967_v25, 0.0  ;;  %v296_v10 = vadd.f32 %v294_v7, %v967_v25 }
 0x14d   :  { %104 = vadd.xlane.f32.xlu0 %v103_v26 }
 0x163   :  { %112 = vrot.lane.b32.xlu0 %v924_v2, %s851_s10 }
 0x1ba   :  { %v111_v30 = vpop.xlane.xlu1 %110 }
 0x1bb   :  { %v253_v31 = vsel %vm252_vm4, %v251_v29, %v111_v30  ;;  %v293_v29 = vadd.f32 %v291_v28, %v940_v6 }
 0x1bd   :  { %v295_v30 = vadd.f32 %v293_v29, %v944_v8 }
 0x1be   :  { %v975_v32 = vpop.permute.xlu1 %118 }
 0x1bf   :  { %v121_v33 = vsel %vm61_vm0, %v975_v32, 0.0 }
 0x1c0   :  { %122 = vadd.xlane.f32.xlu1 %v121_v33 }
 0x1d1   :  { %130 = vrot.lane.b32.xlu1 %v916_v0, %s853_s12 }
 0x1d6   :  { %v105_v34 = vpop.xlane.xlu0 %104 }
 0x1d7   :  { %v278_v35 = vsel %vm250_vm3, %v277_v24, %v105_v34  ;;  %vm272_vm3 = vcmask 113664  }
 0x1da   :  { %v113_v36 = vpop.permute.xlu0 %112 }
 0x1db   :  { %v115_v37 = vsel %vm61_vm0, %v113_v36, 0.0  ;;  %v298_v11 = vadd.f32 %v296_v10, %v113_v36 }
 0x1dc   :  { %116 = vadd.xlane.f32.xlu0 %v115_v37 }
 0x1f2   :  { %124 = vrot.lane.b32.xlu0 %v924_v2, %s852_s11 }
 0x249   :  { %v123_v38 = vpop.xlane.xlu1 %122 }
 0x24a   :  { %v255_v39 = vsel %vm254_vm5, %v253_v31, %v123_v38  ;;  %v297_v31 = vadd.f32 %v295_v30, %v960_v19 }
 0x24c   :  { %v299_v33 = vadd.f32 %v297_v31, %v975_v32 }
 0x24d   :  { %v985_v40 = vpop.permute.xlu1 %130 }
 0x24e   :  { %v133_v41 = vsel %vm61_vm0, %v985_v40, 0.0  ;;  %v301_v34 = vadd.f32 %v299_v33, %v985_v40 }
 0x24f   :  { %134 = vadd.xlane.f32.xlu1 %v133_v41 }
 0x260   :  { %142 = vrot.lane.b32.xlu1 %v916_v0, %s854_s13 }
 0x265   :  { %v117_v42 = vpop.xlane.xlu0 %116 }
 0x266   :  { %v279_v43 = vsel %vm252_vm4, %v278_v35, %v117_v42  ;;  %vm274_vm4 = vcmask 121856  }
 0x269   :  { %v125_v44 = vpop.permute.xlu0 %124 }
 0x26a   :  { %v127_v45 = vsel %vm61_vm0, %v125_v44, 0.0  ;;  %v300_v16 = vadd.f32 %v298_v11, %v125_v44 }
 0x26b   :  { %128 = vadd.xlane.f32.xlu0 %v127_v45 }
 0x281   :  { %136 = vrot.lane.b32.xlu0 %v924_v2, %s853_s12 }
 0x2d8   :  { %v135_v46 = vpop.xlane.xlu1 %134 }
 0x2d9   :  { %v257_v47 = vsel %vm256_vm6, %v255_v39, %v135_v46 }
 0x2dc   :  { %v996_v48 = vpop.permute.xlu1 %142 }
 0x2dd   :  { %v145_v49 = vsel %vm61_vm0, %v996_v48, 0.0  ;;  %v303_v36 = vadd.f32 %v301_v34, %v996_v48 }
 0x2de   :  { %146 = vadd.xlane.f32.xlu1 %v145_v49 }
 0x2df   :  { %v305_v0 = vadd.f32 %v303_v36, %v1003_v50  ;;  %v447_v36 = vstv %s731_s16 }
 0x2e2   :  { %155 = vadd.xlane.f32.xlu1 %v154_v51 }
 0x2e6   :  { %158 = vadd.xlane.f32.xlu1 %v157_v53 }
 0x2f4   :  { %v129_v54 = vpop.xlane.xlu0 %128 }
 0x2f5   :  { %v280_v55 = vsel %vm254_vm5, %v279_v43, %v129_v54 }
 0x2f7   :  { %161 = vrot.lane.b32.xlu1 %v1003_v50, %s848_s4 }
 0x2f8   :  { %v137_v56 = vpop.permute.xlu0 %136 }
 0x2f9   :  { %v139_v57 = vsel %vm61_vm0, %v137_v56, 0.0  ;;  %v302_v18 = vadd.f32 %v300_v16, %v137_v56 }
 0x2fa   :  { %140 = vadd.xlane.f32.xlu0 %v139_v57 }
 0x2fb   :  { %186 = vrot.lane.b32.xlu1 %v1003_v50, %s850_s9 }
 0x2ff   :  { %198 = vrot.lane.b32.xlu1 %v1003_v50, %s851_s10 }
 0x303   :  { %210 = vrot.lane.b32.xlu1 %v1003_v50, %s852_s11 }
 0x307   :  { %222 = vrot.lane.b32.xlu1 %v1003_v50, %s853_s12 }
 0x30b   :  { %168 = vrot.lane.b32.xlu1 %v60_v52, %s848_s4 }
 0x30f   :  { %234 = vrot.lane.b32.xlu1 %v1003_v50, %s854_s13 }
 0x310   :  { %148 = vrot.lane.b32.xlu0 %v924_v2, %s854_s13 }
 0x313   :  { %192 = vrot.lane.b32.xlu1 %v60_v52, %s850_s9 }
 0x317   :  { %216 = vrot.lane.b32.xlu1 %v60_v52, %s852_s11 }
 0x31b   :  { %240 = vrot.lane.b32.xlu1 %v60_v52, %s854_s13 }
 0x367   :  { %v147_v58 = vpop.xlane.xlu1 %146 }
 0x368   :  { %v259_v59 = vsel %vm258_vm7, %v257_v47, %v147_v58 }
 0x36b   :  { %v156_v60 = vpop.xlane.xlu1 %155 }
 0x36c   :  { %v261_v61 = vsel %vm260_vm8, %v259_v59, %v156_v60 }
 0x36f   :  { %v1032_v62 = vpop.xlane.xlu1 %158 }
 0x373   :  { %v162_v63 = vpop.permute.xlu1 %161 }
 0x374   :  { %v164_v2 = vsel %vm61_vm0, %v162_v63, 0.0  ;;  %v307_v6 = vadd.f32 %v305_v0, %v162_v63 }
 0x377   :  { %v187_v1 = vpop.permute.xlu1 %186 }
 0x378   :  { %v189_v25 = vsel %vm61_vm0, %v187_v1, 0.0 }
 0x37b   :  { %v199_v3 = vpop.permute.xlu1 %198 }
 0x37c   :  { %v201_v26 = vsel %vm61_vm0, %v199_v3, 0.0 }
 0x37f   :  { %v211_v9 = vpop.permute.xlu1 %210 }
 0x380   :  { %v213_v45 = vsel %vm61_vm0, %v211_v9, 0.0 }
 0x383   :  { %v141_v13 = vpop.xlane.xlu0 %140  ;;  %v223_v15 = vpop.permute.xlu1 %222 }
 0x384   :  { %v281_v17 = vsel %vm256_vm6, %v280_v55, %v141_v13  ;;  %v225_v27 = vsel %vm61_vm0, %v223_v15, 0.0 }
 0x387   :  { %v149_v20 = vpop.permute.xlu0 %148  ;;  %v169_v23 = vpop.permute.xlu1 %168 }
 0x388   :  { %v304_v21 = vadd.f32 %v302_v18, %v149_v20  ;;  %v151_v22 = vsel %vm61_vm0, %v149_v20, 0.0  ;;  %v171_v14 = vsel %vm61_vm0, %v169_v23, 0.0 }
 0x389   :  { %152 = vadd.xlane.f32.xlu0 %v151_v22 }
 0x38a   :  { %v306_v24 = vadd.f32 %v304_v21, %v60_v52 }
 0x38b   :  { %v235_v38 = vpop.permute.xlu1 %234 }
 0x38c   :  { %v308_v12 = vadd.f32 %v306_v24, %v169_v23  ;;  %v237_v51 = vsel %vm61_vm0, %v235_v38, 0.0 }
 0x38d   :  { %165 = vadd.xlane.f32.xlu0 %v164_v2 }
 0x38f   :  { %v193_v19 = vpop.permute.xlu1 %192 }
 0x390   :  { %v195_v58 = vsel %vm61_vm0, %v193_v19, 0.0 }
 0x393   :  { %v217_v47 = vpop.permute.xlu1 %216 }
 0x397   :  { %v241_v60 = vpop.permute.xlu1 %240 }
 0x398   :  { %v243_v18 = vsel %vm61_vm0, %v241_v60, 0.0 }
 0x3a3   :  { %174 = vrot.lane.b32.xlu0 %v1003_v50, %s849_s8 }
 0x3a7   :  { %180 = vrot.lane.b32.xlu0 %v60_v52, %s849_s8 }
 0x3ab   :  { %204 = vrot.lane.b32.xlu0 %v60_v52, %s851_s10 }
 0x3af   :  { %228 = vrot.lane.b32.xlu0 %v60_v52, %s853_s12 }
 0x3ce   :  { %172 = vadd.xlane.f32.xlu0 %v171_v14 }
 0x3d2   :  { %190 = vadd.xlane.f32.xlu0 %v189_v25 }
 0x3d6   :  { %202 = vadd.xlane.f32.xlu0 %v201_v26 }
 0x3da   :  { %226 = vadd.xlane.f32.xlu0 %v225_v27 }
 0x412   :  { %v153_v35 = vpop.xlane.xlu0 %152 }
 0x413   :  { %v1059_v37 = vsel %vm258_vm7, %v281_v17, %v153_v35  ;;  %vm480_vm7 = vcmask 138240  }
 0x416   :  { %v166_v39 = vpop.xlane.xlu0 %165 }
 0x417   :  { %v1063_v4 = vsel %vm262_vm9, %v261_v61, %v166_v39  ;;  %v450_v39 = vstv %s732_s17 }
 0x41a   :  { %v175_v8 = vpop.permute.xlu0 %174 }
 0x41b   :  { %v309_v32 = vadd.f32 %v307_v6, %v175_v8  ;;  %v177_v40 = vsel %vm61_vm0, %v175_v8, 0.0 }
 0x41c   :  { %178 = vadd.xlane.f32.xlu1 %v177_v40 }
 0x41d   :  { %v311_v41 = vadd.f32 %v309_v32, %v187_v1 }
 0x41e   :  { %v181_v42 = vpop.permute.xlu0 %180 }
 0x41f   :  { %v313_v43 = vadd.f32 %v311_v41, %v199_v3  ;;  %v310_v44 = vadd.f32 %v308_v12, %v181_v42  ;;  %v183_v46 = vsel %vm61_vm0, %v181_v42, 0.0 }
 0x420   :  { %214 = vadd.xlane.f32.xlu1 %v213_v45  ;;  %184 = vadd.xlane.f32.xlu0 %v183_v46 }
 0x421   :  { %v315_v48 = vadd.f32 %v313_v43, %v211_v9  ;;  %v312_v49 = vadd.f32 %v310_v44, %v193_v19  ;;  %v219_v9 = vsel %vm61_vm0, %v217_v47, 0.0 }
 0x422   :  { %v205_v52 = vpop.permute.xlu0 %204 }
 0x423   :  { %v317_v53 = vadd.f32 %v315_v48, %v223_v15  ;;  %v314_v54 = vadd.f32 %v312_v49, %v205_v52  ;;  %v207_v55 = vsel %vm61_vm0, %v205_v52, 0.0 }
 0x424   :  { %238 = vadd.xlane.f32.xlu1 %v237_v51  ;;  %208 = vadd.xlane.f32.xlu0 %v207_v55 }
 0x425   :  { %v319_v56 = vadd.f32 %v317_v53, %v235_v38  ;;  %v316_v57 = vadd.f32 %v314_v54, %v217_v47 }
 0x426   :  { %v229_v59 = vpop.permute.xlu0 %228 }
 0x427   :  { %v357_v61 = vrot.slane %v319_v56, 1  ;;  %v318_v63 = vadd.f32 %v316_v57, %v229_v59  ;;  %v231_v1 = vsel %vm61_vm0, %v229_v59, 0.0  ;;  %v360_v5 = vrot.slane %v319_v56, 2 }
 0x428   :  { %196 = vadd.xlane.f32.xlu1 %v195_v58  ;;  %232 = vadd.xlane.f32.xlu0 %v231_v1  ;;  %v363_v11 = vrot.slane %v319_v56, 3 }
 0x429   :  { %v359_v3 = vadd.f32 %v357_v61, %v319_v56  ;;  %v320_v7 = vadd.f32 %v318_v63, %v241_v60 }
 0x42b   :  { %v362_v10 = vadd.f32 %v360_v5, %v359_v3  ;;  %v371_v13 = vrot.slane %v320_v7, 1  ;;  %v374_v17 = vrot.slane %v320_v7, 2  ;;  %v377_v22 = vrot.slane %v320_v7, 3 }
 0x42c   :  { %220 = vadd.xlane.f32.xlu1 %v219_v9 }
 0x42d   :  { %v365_v15 = vadd.f32 %v363_v11, %v362_v10  ;;  %v373_v16 = vadd.f32 %v371_v13, %v320_v7 }
 0x42f   :  { %v367_v20 = vrot.slane %v365_v15, 3  ;;  %v376_v21 = vadd.f32 %v374_v17, %v373_v16 }
 0x430   :  { %244 = vadd.xlane.f32.xlu1 %v243_v18 }
 0x431   :  { %v379_v23 = vadd.f32 %v377_v22, %v376_v21  ;;  %v369_v24 = vsel %vm340_vm10, %v365_v15, %v367_v20 }
 0x432   :  { %v432_v2 = vmul.f32 0.015625, %v369_v24 }
 0x433   :  { %v381_v12 = vrot.slane %v379_v23, 3 }
 0x434   :  { %v433_v14 = vmul.f32 64.0, %v432_v2  ;;  %v448_v6 = vmul.f32 %v447_v36, %v432_v2 }
 0x435   :  { %v383_v26 = vsel %vm340_vm10, %v379_v23, %v381_v12 }
 0x436   :  { %v434_v25 = vmul.f32 %v433_v14, %v432_v2 }
 0x438   :  { %v435_v27 = vsub.f32 %v383_v26, %v434_v25 }
 0x43a   :  { %v436_v28 = vmax.f32 %v435_v27, 0.0 }
 0x43c   :  { %v437_v29 = vmul.f32 0.015873017, %v436_v28 }
 0x43e   :  { %786 = vrsqrt.f32 %v437_v29  ;;  %vm440_vm11 = vcmp.eq.f32.partialorder %v437_v29, inf  ;;  %v443_v33 = vand.u32 2147483648, %v437_v29  ;;  %vm442_vm12 = vcmp.eq.f32.partialorder %v437_v29, 0.0 }
 0x44b   :  { %v787_v30 = vpop.eup %786 }
 0x44c   :  { %v439_v31 = vmul.f32 %v787_v30, %v437_v29 }
 0x44e   :  { %v441_v34 = vsel %vm440_vm11, %v437_v29, %v439_v31 }
 0x44f   :  { %v444_v35 = vsel %vm442_vm12, %v443_v33, %v441_v34  ;;  %vm676_vm12 = vcmask 261120  }
 0x450   :  { %v445_v38 = vadd.f32 %v444_v35, %v432_v2  ;;  %v451_v19 = vmul.f32 %v450_v39, %v444_v35 }
 0x452   :  { %v446_v0 = vmul.f32 0.5, %v445_v38  ;;  %v424_v38 = vstv %s729_s18 }
 0x454   :  { %v449_v8 = vadd.f32 %v448_v6, %v446_v0  ;;  %v427_v0 = vstv %s730_s19 }
 0x456   :  { %v1076_v32 = vadd.f32 %v451_v19, %v449_v8 }
 0x457   :  { %v173_v40 = vpop.xlane.xlu0 %172 }
 0x45b   :  { %v191_v41 = vpop.xlane.xlu0 %190 }
 0x45f   :  { %v203_v42 = vpop.xlane.xlu0 %202 }
 0x463   :  { %v227_v46 = vpop.xlane.xlu0 %226 }
 0x4a5   :  { %v179_v43 = vpop.xlane.xlu1 %178 }
 0x4a6   :  { %v265_v44 = vsel %vm264_vm13, %v1063_v4, %v179_v43  ;;  %v283_v4 = vsel %vm260_vm8, %v1059_v37, %v1032_v62  ;;  %v486_v43 = vstv %s734_s21 }
 0x4a7   :  { %v267_v45 = vsel %vm266_vm14, %v265_v44, %v191_v41  ;;  %v284_v57 = vsel %vm262_vm9, %v283_v4, %v173_v40  ;;  %v517_v4 = vstv %s737_s24 }
 0x4a8   :  { %v269_v47 = vsel %vm268_vm15, %v267_v45, %v203_v42 }
 0x4a9   :  { %v215_v48 = vpop.xlane.xlu1 %214  ;;  %v185_v51 = vpop.xlane.xlu0 %184 }
 0x4aa   :  { %v271_v49 = vsel %vm270_vm2, %v269_v47, %v215_v48  ;;  %v285_v59 = vsel %vm264_vm13, %v284_v57, %v185_v51  ;;  %v494_v48 = vstv %s735_s22  ;;  %v859_v57 = vmov 0  }
 0x4ab   :  { %v273_v53 = vsel %vm272_vm3, %v271_v49, %v227_v46  ;;  %v525_v49 = vstv %s738_s23  ;;  %769 = vset.pattern.permute.xlu1 %v859_v57  ;;  %vm678_vm13 = vcmask 392192  }
 0x4ad   :  { %v239_v52 = vpop.xlane.xlu1 %238  ;;  %v209_v58 = vpop.xlane.xlu0 %208 }
 0x4ae   :  { %v275_v54 = vsel %vm274_vm4, %v273_v53, %v239_v52 }
 0x4af   :  { %v328_v55 = vrot.slane %v275_v54, 1  ;;  %v321_v56 = vsel %vm61_vm0, %v275_v54, 0.0  ;;  %v331_v61 = vrot.slane %v275_v54, 2  ;;  %v334_v5 = vrot.slane %v275_v54, 3 }
 0x4b0   :  { %322 = vadd.xlane.f32.xlu0 %v321_v56  ;;  %v858_v56 = vmov 1  }
 0x4b1   :  { %v330_v60 = vadd.f32 %v328_v55, %v275_v54  ;;  %v197_v63 = vpop.xlane.xlu1 %196  ;;  %v233_v10 = vpop.xlane.xlu0 %232  ;;  %770 = vset.pattern.permute.xlu0 %v858_v56 }
 0x4b2   :  { %v286_v1 = vsel %vm266_vm14, %v285_v59, %v197_v63  ;;  %v483_v59 = vstv %s482_s3  ;;  %vm680_vm14 = vcmask 523264  }
 0x4b3   :  { %v333_v3 = vadd.f32 %v331_v61, %v330_v60  ;;  %v287_v9 = vsel %vm268_vm15, %v286_v1, %v209_v58  ;;  %vm682_vm15 = vcmask 654336  }
 0x4b5   :  { %v336_v7 = vadd.f32 %v334_v5, %v333_v3  ;;  %v221_v62 = vpop.xlane.xlu1 %220 }
 0x4b6   :  { %v288_v37 = vsel %vm270_vm2, %v287_v9, %v221_v62  ;;  %vm684_vm2 = vcmask 785408  }
 0x4b7   :  { %v338_v11 = vrot.slane %v336_v7, 3  ;;  %v289_v15 = vsel %vm272_vm3, %v288_v37, %v233_v10  ;;  %v860_v37 = vmov 4   ;;  %v861_v10 = vmov 2  }
 0x4b8   :  { %vm686_vm3 = vcmask 916480  }
 0x4b9   :  { %v341_v13 = vsel %vm340_vm10, %v336_v7, %v338_v11  ;;  %v245_v16 = vpop.xlane.xlu1 %244  ;;  %v862_v11 = vmov 7  }
 0x4ba   :  { %v290_v17 = vsel %vm274_vm4, %v289_v15, %v245_v16  ;;  %v409_v21 = vmul.f32 0.015625, %v341_v13  ;;  %v863_v13 = vmov 3   ;;  %v864_v15 = vmov 10  }
 0x4bb   :  { %v343_v18 = vrot.slane %v290_v17, 1  ;;  %v324_v20 = vsel %vm61_vm0, %v290_v17, 0.0  ;;  %v346_v23 = vrot.slane %v290_v17, 2  ;;  %v349_v2 = vrot.slane %v290_v17, 3 }
 0x4bc   :  { %325 = vadd.xlane.f32.xlu1 %v324_v20  ;;  %v410_v12 = vmul.f32 64.0, %v409_v21  ;;  %v425_v8 = vmul.f32 %v424_v38, %v409_v21  ;;  %v865_v16 = vmov 5   ;;  %v868_v20 = vmov 8  }
 0x4bd   :  { %v345_v22 = vadd.f32 %v343_v18, %v290_v17  ;;  %v866_v17 = vmov 13   ;;  %v867_v18 = vmov 6   ;;  %vm711_vm4 = vcmask 1043456  }
 0x4be   :  { %v411_v26 = vmul.f32 %v410_v12, %v409_v21  ;;  %v514_v12 = vstv %s513_s1 }
 0x4bf   :  { %v348_v24 = vadd.f32 %v346_v23, %v345_v22  ;;  %v870_v22 = vmov 9   ;;  %v871_v23 = vmov 11  }
 0x4c1   :  { %v351_v14 = vadd.f32 %v349_v2, %v348_v24  ;;  %v872_v24 = vmov 12   ;;  %v873_v2 = vmov 14  }
 0x4c3   :  { %v353_v25 = vrot.slane %v351_v14, 3 }
 0x4c5   :  { %v355_v27 = vsel %vm340_vm10, %v351_v14, %v353_v25 }
 0x4c6   :  { %v412_v28 = vsub.f32 %v355_v27, %v411_v26 }
 0x4c8   :  { %v413_v29 = vmax.f32 %v412_v28, 0.0 }
 0x4ca   :  { %v414_v30 = vmul.f32 0.015873017, %v413_v29 }
 0x4cc   :  { %788 = vrsqrt.f32 %v414_v30  ;;  %vm417_vm5 = vcmp.eq.f32.partialorder %v414_v30, inf  ;;  %v420_v34 = vand.u32 2147483648, %v414_v30  ;;  %vm419_vm6 = vcmp.eq.f32.partialorder %v414_v30, 0.0 }
 0x4d9   :  { %v789_v31 = vpop.eup %788 }
 0x4da   :  { %v416_v33 = vmul.f32 %v789_v31, %v414_v30 }
 0x4dc   :  { %v418_v35 = vsel %vm417_vm5, %v414_v30, %v416_v33 }
 0x4dd   :  { %v421_v36 = vsel %vm419_vm6, %v420_v34, %v418_v35 }
 0x4de   :  { %v422_v39 = vadd.f32 %v421_v36, %v409_v21  ;;  %v428_v40 = vmul.f32 %v427_v0, %v421_v36  ;;  %v869_v21 = vmov 15  }
 0x4e0   :  { %v423_v6 = vmul.f32 0.5, %v422_v39 }
 0x4e2   :  { %v426_v19 = vadd.f32 %v425_v8, %v423_v6 }
 0x4e4   :  { %v429_v41 = vadd.f32 %v428_v40, %v426_v19 }
 0x4e6   :  { %476 = vrot.lane.b32.xlu0 %v429_v41, %s855_s20 }
 0x4ea   :  { %508 = vrot.lane.b32.xlu0 %v1076_v32, %s855_s20 }
 0x539   :  { %v1100_v42 = vpop.xlane.xlu0 %322 }
 0x545   :  { %v1108_v58 = vpop.xlane.xlu1 %325 }
 0x558   :  { %v477_v44 = vpop.permute.xlu0 %476 }
 0x559   :  { %v479_v45 = vsel %vm246_vm1, 0.0, %v477_v44 }
 0x55a   :  { %v481_v46 = vsel %vm480_vm7, %v479_v45, 0.0 }
 0x55b   :  { %v487_v47 = vmul.f32 %v486_v43, %v481_v46  ;;  %v495_v53 = vmul.f32 %v494_v48, %v481_v46  ;;  %v484_v61 = vmul.f32 %v483_v59, %v481_v46 }
 0x55c   :  { %v509_v51 = vpop.permute.xlu0 %508 }
 0x55d   :  { %v511_v52 = vsel %vm246_vm1, 0.0, %v509_v51  ;;  %489 = vrot.lane.b32.xlu1 %v487_v47, %s856_s25 }
 0x55e   :  { %v1104_v32 = vsel %vm480_vm7, %v511_v52, 0.0 }
 0x55f   :  { %v526_v54 = vmul.f32 %v525_v49, %v1104_v32  ;;  %v518_v55 = vmul.f32 %v517_v4, %v1104_v32  ;;  %v515_v25 = vmul.f32 %v514_v12, %v1104_v32 }
 0x561   :  { %497 = vrot.lane.b32.xlu1 %v495_v53, %s857_s26  ;;  %528 = vrot.lane.b32.xlu0 %v526_v54, %s857_s26  ;;  %v386_v54 = vmul.f32 0.00390625, %v1100_v42 }
 0x563   :  { %v387_v57 = vmul.f32 256.0, %v386_v54 }
 0x565   :  { %520 = vrot.lane.b32.xlu1 %v518_v55, %s856_s25 }
 0x5cf   :  { %v490_v60 = vpop.permute.xlu1 %489 }
 0x5d0   :  { %v492_v63 = vadd.f32 %v490_v60, %v484_v61 }
 0x5d3   :  { %v498_v1 = vpop.permute.xlu1 %497  ;;  %v529_v27 = vpop.permute.xlu0 %528 }
 0x5d4   :  { %v500_v3 = vadd.f32 %v498_v1, %v492_v63  ;;  %v388_v63 = vmul.f32 %v387_v57, %v386_v54 }
 0x5d6   :  { %v736_v5 = vmul.f32 -1.442695, %v500_v3  ;;  %v389_v1 = vsub.f32 %v1108_v58, %v388_v63 }
 0x5d7   :  { %v521_v14 = vpop.permute.xlu1 %520 }
 0x5d8   :  { %790 = vpow2.f32 %v736_v5  ;;  %v523_v26 = vadd.f32 %v521_v14, %v515_v25  ;;  %v466_v14 = vstv %s1170_s2 }
 0x5da   :  { %v531_v28 = vadd.f32 %v529_v27, %v523_v26 }
 0x5dc   :  { %v739_v29 = vmul.f32 -1.442695, %v531_v28 }
 0x5e5   :  { %v791_v7 = vpop.eup %790 }
 0x5e6   :  { %v504_v9 = vadd.f32 1.0, %v791_v7  ;;  %v390_v7 = vmax.f32 %v389_v1, 0.0 }
 0x5e8   :  { %792 = vrcp.f32 %v504_v9 }
 0x5e9   :  { %794 = vpow2.f32 %v739_v29 }
 0x5f5   :  { %v793_v62 = vpop.eup %792 }
 0x5f6   :  { %545 = vperm.xlu0 %770, %v793_v62   ;;  %540 = vperm.xlu1 %769, %v793_v62   ;;  %v795_v30 = vpop.eup %794 }
 0x5f7   :  { %v535_v31 = vadd.f32 1.0, %v795_v30 }
 0x5f9   :  { %796 = vrcp.f32 %v535_v31 }
 0x5fa   :  { %773 = vset.pattern.permute.xlu0 %v860_v37  ;;  %771 = vset.pattern.permute.xlu1 %v861_v10 }
 0x5fb   :  { %560 = vperm.xlu0 %773, %v793_v62   ;;  %550 = vperm.xlu1 %771, %v793_v62  }
 0x5ff   :  { %776 = vset.pattern.permute.xlu0 %v862_v11  ;;  %772 = vset.pattern.permute.xlu1 %v863_v13 }
 0x600   :  { %575 = vperm.xlu0 %776, %v793_v62   ;;  %555 = vperm.xlu1 %772, %v793_v62  }
 0x604   :  { %779 = vset.pattern.permute.xlu0 %v864_v15  ;;  %774 = vset.pattern.permute.xlu1 %v865_v16  ;;  %v453_v16 = vlaneseq }
 0x605   :  { %590 = vperm.xlu0 %779, %v793_v62   ;;  %565 = vperm.xlu1 %774, %v793_v62  }
 0x606   :  { %v797_v33 = vpop.eup %796 }
 0x609   :  { %782 = vset.pattern.permute.xlu0 %v866_v17  ;;  %775 = vset.pattern.permute.xlu1 %v867_v18  ;;  %v401_v17 = vstv %s384_s27 }
 0x60a   :  { %605 = vperm.xlu0 %782, %v793_v62   ;;  %570 = vperm.xlu1 %775, %v793_v62  }
 0x60e   :  { %777 = vset.pattern.permute.xlu1 %v868_v20  ;;  %785 = vset.pattern.permute.xlu0 %v869_v21  ;;  %v402_v20 = vmul.f32 %v401_v17, %v386_v54 }
 0x60f   :  { %580 = vperm.xlu1 %777, %v793_v62  }
 0x613   :  { %778 = vset.pattern.permute.xlu1 %v870_v22  ;;  %v404_v22 = vstv %s728_s28 }
 0x614   :  { %585 = vperm.xlu1 %778, %v793_v62  }
 0x618   :  { %780 = vset.pattern.permute.xlu1 %v871_v23 }
 0x619   :  { %595 = vperm.xlu1 %780, %v793_v62  }
 0x61d   :  { %781 = vset.pattern.permute.xlu1 %v872_v24 }
 0x61e   :  { %600 = vperm.xlu1 %781, %v793_v62  }
 0x622   :  { %783 = vset.pattern.permute.xlu1 %v873_v2 }
 0x623   :  { %610 = vperm.xlu1 %783, %v793_v62  }
 0x627   :  { %784 = vset.pattern.permute.xlu1 %v869_v21  ;;  %v1131_v21 = vshrl.u32 %v453_v16, 7 }
 0x628   :  { %615 = vperm.xlu1 %784, %v793_v62   ;;  %v391_v62 = vmul.f32 0.003921569, %v390_v7 }
 0x629   :  { %vm457_vm9 = vcmp.lt.s32.totalorder %v1131_v21, 4  ;;  %vm460_vm10 = vcmp.ge.s32.totalorder %v1131_v21, 4 }
 0x62a   :  { %798 = vrsqrt.f32 %v391_v62  ;;  %vm394_vm1 = vcmp.eq.f32.partialorder %v391_v62, inf  ;;  %v397_v13 = vand.u32 2147483648, %v391_v62  ;;  %vm396_vm8 = vcmp.eq.f32.partialorder %v391_v62, 0.0  ;;  %vm463_vm11 = vmor %vm457_vm9, %vm460_vm10 }
 0x637   :  { %v799_v37 = vpop.eup %798 }
 0x638   :  { %v393_v10 = vmul.f32 %v799_v37, %v391_v62 }
 0x63a   :  { %v395_v11 = vsel %vm394_vm1, %v391_v62, %v393_v10 }
 0x63b   :  { %v398_v15 = vsel %vm396_vm8, %v397_v13, %v395_v11 }
 0x63c   :  { %v399_v58 = vadd.f32 %v398_v15, %v386_v54  ;;  %v405_v24 = vmul.f32 %v404_v22, %v398_v15 }
 0x63e   :  { %v400_v18 = vmul.f32 0.5, %v399_v58 }
 0x640   :  { %v403_v23 = vadd.f32 %v402_v20, %v400_v18 }
 0x642   :  { %v406_v2 = vadd.f32 %v405_v24, %v403_v23 }
 0x644   :  { %v465_v12 = vsel %vm463_vm11, %v406_v2, 0.0 }
 0x645   :  { %v467_v25 = vmul.f32 %v466_v14, %v465_v12 }
 0x647   :  { %v733_v26 = vmul.f32 -1.442695, %v467_v25 }
 0x649   :  { %800 = vpow2.f32 %v733_v26 }
 0x656   :  { %v801_v27 = vpop.eup %800 }
 0x657   :  { %v472_v29 = vadd.f32 1.0, %v801_v27 }
 0x659   :  { %802 = vrcp.f32 %v472_v29 }
 0x671   :  { %v546_v34 = vpop.permute.xlu0 %545  ;;  %v541_v35 = vpop.permute.xlu1 %540 }
 0x672   :  { %v548_v36 = vadd.f32 %v797_v33, %v546_v34  ;;  %v1111_v38 = vadd.f32 %v797_v33, %v541_v35 }
 0x674   :  { %620 = vrot.lane.b32.xlu0 %v548_v36, %s854_s13 }
 0x676   :  { %v551_v39 = vpop.permute.xlu1 %550  ;;  %v561_v6 = vpop.permute.xlu0 %560 }
 0x677   :  { %v553_v0 = vadd.f32 %v797_v33, %v551_v39  ;;  %v563_v8 = vadd.f32 %v797_v33, %v561_v6  ;;  %v697_v6 = vsub.s32 0, %v1131_v21 }
 0x679   :  { %624 = vrot.lane.b32.xlu1 %v553_v0, %s853_s12 }
 0x67b   :  { %v556_v19 = vpop.permute.xlu1 %555  ;;  %v576_v41 = vpop.permute.xlu0 %575 }
 0x67c   :  { %v558_v40 = vadd.f32 %v797_v33, %v556_v19  ;;  %v578_v45 = vadd.f32 %v797_v33, %v576_v41 }
 0x67d   :  { %632 = vrot.lane.b32.xlu1 %v563_v8, %s851_s10  ;;  %v705_v8 = vsub.s32 1, %v1131_v21 }
 0x67e   :  { %628 = vrot.lane.b32.xlu0 %v558_v40, %s852_s11 }
 0x680   :  { %v566_v43 = vpop.permute.xlu1 %565  ;;  %v591_v47 = vpop.permute.xlu0 %590 }
 0x681   :  { %v568_v44 = vadd.f32 %v797_v33, %v566_v43  ;;  %v593_v49 = vadd.f32 %v797_v33, %v591_v47 }
 0x683   :  { %636 = vrot.lane.b32.xlu0 %v568_v44, %s850_s9 }
 0x685   :  { %v571_v46 = vpop.permute.xlu1 %570  ;;  %v606_v56 = vpop.permute.xlu0 %605 }
 0x686   :  { %v573_v48 = vadd.f32 %v797_v33, %v571_v46  ;;  %v608_v59 = vadd.f32 %v797_v33, %v606_v56  ;;  %v803_v46 = vpop.eup %802 }
 0x687   :  { %644 = vrot.lane.b32.xlu0 %v578_v45, %s848_s4 }
 0x688   :  { %640 = vrot.lane.b32.xlu1 %v573_v48, %s849_s8 }
 0x68a   :  { %v581_v51 = vpop.permute.xlu1 %580 }
 0x68b   :  { %v1120_v52 = vadd.f32 %v797_v33, %v581_v51  ;;  %652 = vrot.lane.b32.xlu0 %v593_v49, %s853_s12  ;;  %v804_v49 = vld [vmem:[%s1168_s0] sm:$0xff] }
 0x68f   :  { %v586_v32 = vpop.permute.xlu1 %585 }
 0x690   :  { %v588_v53 = vadd.f32 %v797_v33, %v586_v32 }
 0x692   :  { %648 = vrot.lane.b32.xlu1 %v588_v53, %s854_s13 }
 0x694   :  { %v596_v4 = vpop.permute.xlu1 %595 }
 0x695   :  { %v598_v55 = vadd.f32 %v797_v33, %v596_v4 }
 0x697   :  { %656 = vrot.lane.b32.xlu1 %v598_v55, %s852_s11 }
 0x699   :  { %v601_v60 = vpop.permute.xlu1 %600 }
 0x69a   :  { %v603_v61 = vadd.f32 %v797_v33, %v601_v60 }
 0x69b   :  { %664 = vrot.lane.b32.xlu1 %v608_v59, %s850_s9 }
 0x69c   :  { %660 = vrot.lane.b32.xlu0 %v603_v61, %s851_s10 }
 0x69e   :  { %v611_v3 = vpop.permute.xlu1 %610 }
 0x69f   :  { %v613_v5 = vadd.f32 %v797_v33, %v611_v3 }
 0x6a1   :  { %668 = vrot.lane.b32.xlu0 %v613_v5, %s849_s8 }
 0x6a3   :  { %v616_v42 = vpop.permute.xlu1 %615 }
 0x6a4   :  { %v618_v9 = vadd.f32 %v797_v33, %v616_v42 }
 0x6a6   :  { %672 = vrot.lane.b32.xlu1 %v618_v9, %s848_s4 }
 0x6e6   :  { %v621_v28 = vpop.permute.xlu0 %620 }
 0x6e7   :  { %v675_v33 = vsel %vm61_vm0, %v1111_v38, %v621_v28 }
 0x6eb   :  { %v625_v30 = vpop.permute.xlu1 %624 }
 0x6ec   :  { %v677_v34 = vsel %vm676_vm12, %v675_v33, %v625_v30 }
 0x6ef   :  { %v633_v36 = vpop.permute.xlu1 %632 }
 0x6f0   :  { %v629_v31 = vpop.permute.xlu0 %628 }
 0x6f1   :  { %v679_v39 = vsel %vm678_vm13, %v677_v34, %v629_v31 }
 0x6f2   :  { %v681_v0 = vsel %vm680_vm14, %v679_v39, %v633_v36 }
 0x6f5   :  { %v637_v35 = vpop.permute.xlu0 %636 }
 0x6f6   :  { %v683_v19 = vsel %vm682_vm15, %v681_v0, %v637_v35 }
 0x6f9   :  { %v645_v38 = vpop.permute.xlu0 %644 }
 0x6fa   :  { %v641_v40 = vpop.permute.xlu1 %640 }
 0x6fb   :  { %v685_v41 = vsel %vm684_vm2, %v683_v19, %v641_v40 }
 0x6fc   :  { %v687_v43 = vsel %vm686_vm3, %v685_v41, %v645_v38 }
 0x6fd   :  { %v698_v44 = vrot.slane %v687_v43, %v697_v6  ;;  %v706_v45 = vrot.slane %v687_v43, %v705_v8  ;;  %v653_v54 = vpop.permute.xlu0 %652 }
 0x6ff   :  { %v712_v47 = vsel %vm711_vm4, %v698_v44, %v706_v45 }
 0x700   :  { %v714_v48 = vadd.f32 %v803_v46, %v712_v47 }
 0x702   :  { %v716_v51 = vmul.f32 %v804_v49, %v714_v48 }
 0x704   :  { %v718_v32 = vmul.f32 0.33333334, %v716_v51  ;;  %v649_v53 = vpop.permute.xlu1 %648 }
 0x705   :  { %v688_v55 = vsel %vm61_vm0, %v1120_v52, %v649_v53 }
 0x706   :  { %720 = vst [vmem:[%s1173_s5] sm:$0xff] %v718_v32  ;;  %v689_v57 = vsel %vm676_vm12, %v688_v55, %v653_v54 }
 0x709   :  { %v657_v4 = vpop.permute.xlu1 %656 }
 0x70a   :  { %v690_v59 = vsel %vm678_vm13, %v689_v57, %v657_v4 }
 0x70d   :  { %v665_v60 = vpop.permute.xlu1 %664 }
 0x70e   :  { %v661_v56 = vpop.permute.xlu0 %660 }
 0x70f   :  { %v691_v61 = vsel %vm680_vm14, %v690_v59, %v661_v56 }
 0x710   :  { %v692_v1 = vsel %vm682_vm15, %v691_v61, %v665_v60 }
 0x713   :  { %v669_v63 = vpop.permute.xlu0 %668 }
 0x714   :  { %v693_v3 = vsel %vm684_vm2, %v692_v1, %v669_v63 }
 0x718   :  { %v673_v5 = vpop.permute.xlu1 %672 }
 0x719   :  { %v694_v7 = vsel %vm686_vm3, %v693_v3, %v673_v5 }
 0x71a   :  { %v702_v42 = vrot.slane %v694_v7, %v697_v6  ;;  %v710_v9 = vrot.slane %v694_v7, %v705_v8 }
 0x71c   :  { %v713_v52 = vsel %vm711_vm4, %v702_v42, %v710_v9 }
 0x71d   :  { %v715_v62 = vadd.f32 %v803_v46, %v713_v52 }
 0x71f   :  { %v717_v37 = vmul.f32 %v715_v62, %v1003_v50 }
 0x721   :  { %v719_v10 = vmul.f32 0.33333334, %v717_v37 }
 0x723   :  { %721 = vst [vmem:[%s1173_s5 + $0x8] sm:$0xff] %v719_v10 }
 0x724   :  { %726 = vsyncpa [#allocation4], 1 }
 0x725   :  { %727 = vsyncpa [#allocation6], 1 }

</bundles_post_ra>
